<compile_context>
chip_gen: v7x
topology: tpu7x:2x2x1
jax: 0.10.0
libtpu: 0.0.40
codegen_flags: <defaults>
</compile_context>

<pallas_src>
import functools

import jax
import jax.numpy as jnp
from jax.experimental import pallas as pl
from jax.experimental.pallas import tpu as pltpu


def _round_up(v, m):
    return ((v + m - 1) // m) * m


# -----------------------------------------------------------------------------
# Fused kernel: 3x3 same-conv (9 in-kernel taps) + ReLU + global-avg-pool +
# backbone FC (Cout -> F) + classifier Linear (F -> NC), for `bt` images per
# grid step.
#
# Grid: (B_pad // bt,).  Blocks per step:
#   x:     (bt, Cin, Nbig)  bf16  spatially pre-padded image, flattened; lane
#                                 axis is a 128-multiple with slack for taps
#   mask:  (1, Nc)          f32   1/(H*W) on valid conv-output lanes, else 0
#   wconv: (9*Cout, Cin)    bf16  row = tap*Cout + co  (tap = oi*3 + oj)
#   bconv: (Cout, 1)        f32
#   w1:    (Cout, F_pad)    f32   synthetic backbone FC
#   b1:    (1, F_pad)       f32
#   w2:    (F_pad, NC_pad)  f32   classifier Linear (in, out)
#   b2:    (1, NC_pad)      f32
# Output:
#   logits:(bt, NC_pad)     f32   raw logits (`output` in the PyTorch module)
# -----------------------------------------------------------------------------
def cnn_fused_kernel(x_ref, mask_ref, wconv_ref, bconv_ref, w1_ref, b1_ref,
                     w2_ref, b2_ref, logits_ref, *, bt, cout, wp, nc_lanes):
    mask = mask_ref[...]        # (1, Nc)
    bconv = bconv_ref[...]      # (Cout, 1)
    wall = wconv_ref[...]       # (9*Cout, Cin) bf16
    w1 = w1_ref[...]            # (Cout, F_pad)
    b1 = b1_ref[...]            # (1, F_pad)
    w2 = w2_ref[...]            # (F_pad, NC_pad)
    b2 = b2_ref[...]            # (1, NC_pad)

    for b in range(bt):         # static, unrolled over images of this block
        xi = x_ref[b]           # (Cin, Nbig) bf16
        # 3x3 'same' conv: 9 shifted lane-slices of the pre-padded flattened
        # image, each a (Cout,Cin)x(Cin,Nc) MXU matmul accumulated in f32.
        y = None
        for oi in range(3):
            for oj in range(3):
                tap = oi * 3 + oj
                shift = oi * wp + oj
                xt = xi[:, shift:shift + nc_lanes]              # (Cin, Nc)
                wt = wall[tap * cout:(tap + 1) * cout, :]       # (Cout, Cin)
                p = jnp.dot(wt, xt, preferred_element_type=jnp.float32)
                y = p if y is None else y + p
        y = jnp.maximum(y + bconv, 0.0)                         # bias + ReLU
        # Global average pool: mask zeroes pad/garbage lanes and folds 1/(H*W).
        feat = jnp.sum(y * mask, axis=1, keepdims=True)         # (Cout, 1)
        # Backbone FC (Cout -> F): broadcast multiply + sublane reduce (VPU).
        h = jnp.sum(feat * w1, axis=0, keepdims=True) + b1      # (1, F_pad)
        # Classifier Linear(F, NC), f32 for fidelity.
        logits = jnp.dot(h, w2, preferred_element_type=jnp.float32) + b2
        logits_ref[pl.ds(b, 1), :] = logits                     # (1, NC_pad)


@functools.partial(jax.jit, static_argnames=("nc",))
def _cnn_forward_impl(x, wconv, bconv, w1, b1, w2, b2, threshold, *, nc):
    B, Cin, H, W = x.shape
    Cout = bconv.shape[0]
    F_pad = w1.shape[1]
    NC_pad = w2.shape[1]

    Hp, Wp = H + 2, W + 2
    Nc = _round_up(H * Wp, 128)                # conv-output lane extent
    Nbig = _round_up(Nc + 2 * Wp + 2, 128)     # input lane extent (tap slack)

    bt = B if B <= 8 else 8                    # images per grid step
    B_pad = _round_up(B, bt)

    # Lane-dense prep: bf16 cast, 1-pixel spatial zero pad, flatten, lane pad.
    xp = jnp.pad(x.astype(jnp.bfloat16), ((0, 0), (0, 0), (1, 1), (1, 1)))
    xf = xp.reshape(B, Cin, Hp * Wp)
    xf = jnp.pad(xf, ((0, B_pad - B), (0, 0), (0, Nbig - Hp * Wp)))

    # Valid conv-output lanes: q = h*Wp + w with h < H, w < W; scaled by 1/(H*W).
    q = jnp.arange(Nc, dtype=jnp.int32)
    mask = (((q % Wp) < W) & ((q // Wp) < H)).astype(jnp.float32) / float(H * W)
    mask = mask.reshape(1, Nc)

    kern = functools.partial(cnn_fused_kernel, bt=bt, cout=Cout, wp=Wp,
                             nc_lanes=Nc)
    logits_pad = pl.pallas_call(
        kern,
        out_shape=jax.ShapeDtypeStruct((B_pad, NC_pad), jnp.float32),
        grid_spec=pltpu.PrefetchScalarGridSpec(
            num_scalar_prefetch=0,
            grid=(B_pad // bt,),
            in_specs=[
                pl.BlockSpec((bt, Cin, Nbig), lambda i: (i, 0, 0)),
                pl.BlockSpec((1, Nc), lambda i: (0, 0)),
                pl.BlockSpec((9 * Cout, Cin), lambda i: (0, 0)),
                pl.BlockSpec((Cout, 1), lambda i: (0, 0)),
                pl.BlockSpec((Cout, F_pad), lambda i: (0, 0)),
                pl.BlockSpec((1, F_pad), lambda i: (0, 0)),
                pl.BlockSpec((F_pad, NC_pad), lambda i: (0, 0)),
                pl.BlockSpec((1, NC_pad), lambda i: (0, 0)),
            ],
            out_specs=pl.BlockSpec((bt, NC_pad), lambda i: (i, 0)),
        ),
        compiler_params=pltpu.CompilerParams(
            dimension_semantics=("parallel",),
            vmem_limit_bytes=32 * 1024 * 1024,
        ),
    )(xf, mask, wconv, bconv, w1, b1, w2, b2)

    output = logits_pad[:B, :nc]                    # raw logits (`output`)
    preds = jax.nn.sigmoid(output) > threshold      # exact module semantics
    return preds, output


class CNNPallas:
    """Pallas equivalent of the PyTorch CNN module (synthetic backbone)."""

    def __init__(self, classes, threshold=0.5, cin=3, conv_out=8, feat_dim=1000,
                 key=jax.random.PRNGKey(0)):
        self.classes = classes
        self.threshold = float(threshold)
        self.cin = cin
        self.conv_out = conv_out
        nc = len(classes)
        F_pad = _round_up(feat_dim, 128)
        NC_pad = _round_up(max(nc, 1), 128)

        k0, k1, k2, k3, k4 = jax.random.split(key, 5)
        # Stand-in backbone: 3x3 conv (cin->conv_out) + ReLU + global pool + FC.
        conv_w = jax.random.normal(k0, (conv_out, cin, 3, 3), jnp.float32) * 0.1
        conv_b = jax.random.normal(k1, (conv_out,), jnp.float32) * 0.1
        fc_w = jax.random.normal(k2, (conv_out, feat_dim), jnp.float32) * 0.1
        fc_b = jnp.zeros((feat_dim,), jnp.float32)
        # Classifier head: nn.Linear(feat_dim, len(classes)).
        lin_w = jax.random.normal(k3, (feat_dim, nc), jnp.float32) * 0.05
        lin_b = jax.random.normal(k4, (1, nc), jnp.float32) * 0.05
        self._params = (conv_w, conv_b, fc_w, fc_b, lin_w, lin_b)

        # Kernel layouts.  wconv row = tap*Cout + co, tap = oi*3 + oj.
        self.wconv = (conv_w.transpose(2, 3, 0, 1)
                      .reshape(9 * conv_out, cin).astype(jnp.bfloat16))
        self.bconv = conv_b.reshape(conv_out, 1)
        self.w1 = jnp.pad(fc_w, ((0, 0), (0, F_pad - feat_dim)))
        self.b1 = jnp.pad(fc_b, (0, F_pad - feat_dim)).reshape(1, -1)
        self.w2 = jnp.pad(lin_w, ((0, F_pad - feat_dim), (0, NC_pad - nc)))
        self.b2 = jnp.pad(lin_b, ((0, 0), (0, NC_pad - nc)))

    def forward(self, images, captions=None, device=None):
        # torch.stack(images): list of CHW tensors -> (B, Cin, H, W)
        x = jnp.stack(images) if isinstance(images, (list, tuple)) else images
        return _cnn_forward_impl(x, self.wconv, self.bconv, self.w1, self.b1,
                                 self.w2, self.b2, self.threshold,
                                 nc=len(self.classes))

    def reference_logits(self, x):
        """Pure-JAX f32 reference of the same synthetic network (for testing)."""
        conv_w, conv_b, fc_w, fc_b, lin_w, lin_b = self._params
        y = jax.lax.conv_general_dilated(
            x, conv_w, window_strides=(1, 1), padding="SAME",
            dimension_numbers=("NCHW", "OIHW", "NCHW"))
        y = jnp.maximum(y + conv_b[None, :, None, None], 0.0)
        feat = jnp.mean(y, axis=(2, 3))
        h = feat @ fc_w + fc_b
        return h @ lin_w + lin_b


if __name__ == "__main__":
    classes = ["a", "b", "c", "d", "e"]             # num_classes = 5
    model = CNNPallas(classes, threshold=0.5)

    key = jax.random.PRNGKey(0)
    # two NCHW "images", shape (3, 16, 16) each, passed as a list like PyTorch
    imgs = [jax.random.normal(k, (3, 16, 16), jnp.float32)
            for k in jax.random.split(key, 2)]

    preds, output = model.forward(imgs)
    output = jax.block_until_ready(output)
    preds = jax.block_until_ready(preds)

    assert preds.shape == (2, len(classes)) and preds.dtype == jnp.bool_
    assert output.shape == (2, len(classes)) and output.dtype == jnp.float32
    assert bool(jnp.all(jnp.isfinite(output)))

    # Cross-check against a pure-JAX f32 reference of the same synthetic net
    # (loose tolerance: conv inputs/weights are bf16 in the kernel).
    ref = model.reference_logits(jnp.stack(imgs))
    assert bool(jnp.allclose(output, ref, atol=1e-1, rtol=1e-1)), \
        "kernel output does not match reference"

    print("KERNEL_OK")
</pallas_src>

<mosaic_0001>
module attributes {stable_mosaic.version = 11 : i64} {
  func.func @cnn_fused_kernel(%arg0: i32, %arg1: memref<2x3x512xbf16, #tpu.memory_space<vmem>>, %arg2: memref<1x384xf32, #tpu.memory_space<vmem>>, %arg3: memref<72x3xbf16, #tpu.memory_space<vmem>>, %arg4: memref<8x1xf32, #tpu.memory_space<vmem>>, %arg5: memref<8x1024xf32, #tpu.memory_space<vmem>>, %arg6: memref<1x1024xf32, #tpu.memory_space<vmem>>, %arg7: memref<1024x128xf32, #tpu.memory_space<vmem>>, %arg8: memref<1x128xf32, #tpu.memory_space<vmem>>, %arg9: memref<2x128xf32, #tpu.memory_space<vmem>>) attributes {dimension_semantics = [#tpu.dimension_semantics<parallel>], iteration_bounds = array<i64: 1>, scalar_prefetch = 0 : i64, scratch_operands = 0 : i64, tpu.core_type = #tpu.core_type<tc>, window_params = [{transform_indices = @transform_0, window_bounds = array<i64: 2, 3, 512>}, {pipeline_mode = #tpu.pipeline_mode<synchronous>, transform_indices = @transform_1, window_bounds = array<i64: 1, 384>}, {pipeline_mode = #tpu.pipeline_mode<synchronous>, transform_indices = @transform_2, window_bounds = array<i64: 72, 3>}, {pipeline_mode = #tpu.pipeline_mode<synchronous>, transform_indices = @transform_3, window_bounds = array<i64: 8, 1>}, {pipeline_mode = #tpu.pipeline_mode<synchronous>, transform_indices = @transform_4, window_bounds = array<i64: 8, 1024>}, {pipeline_mode = #tpu.pipeline_mode<synchronous>, transform_indices = @transform_5, window_bounds = array<i64: 1, 1024>}, {pipeline_mode = #tpu.pipeline_mode<synchronous>, transform_indices = @transform_6, window_bounds = array<i64: 1024, 128>}, {pipeline_mode = #tpu.pipeline_mode<synchronous>, transform_indices = @transform_7, window_bounds = array<i64: 1, 128>}, {transform_indices = @transform_8, window_bounds = array<i64: 2, 128>}]} {
    %c0 = arith.constant 0 : index
    %c0_0 = arith.constant 0 : index
    %0 = vector.load %arg2[%c0, %c0_0] : memref<1x384xf32, #tpu.memory_space<vmem>>, vector<1x384xf32>
    %c0_1 = arith.constant 0 : index
    %c0_2 = arith.constant 0 : index
    %1 = vector.load %arg4[%c0_1, %c0_2] : memref<8x1xf32, #tpu.memory_space<vmem>>, vector<8x1xf32>
    %c0_3 = arith.constant 0 : index
    %c0_4 = arith.constant 0 : index
    %2 = vector.load %arg3[%c0_3, %c0_4] : memref<72x3xbf16, #tpu.memory_space<vmem>>, vector<72x3xbf16>
    %c0_5 = arith.constant 0 : index
    %c0_6 = arith.constant 0 : index
    %3 = vector.load %arg5[%c0_5, %c0_6] : memref<8x1024xf32, #tpu.memory_space<vmem>>, vector<8x1024xf32>
    %c0_7 = arith.constant 0 : index
    %c0_8 = arith.constant 0 : index
    %4 = vector.load %arg6[%c0_7, %c0_8] : memref<1x1024xf32, #tpu.memory_space<vmem>>, vector<1x1024xf32>
    %c0_9 = arith.constant 0 : index
    %c0_10 = arith.constant 0 : index
    %5 = vector.load %arg7[%c0_9, %c0_10] : memref<1024x128xf32, #tpu.memory_space<vmem>>, vector<1024x128xf32>
    %c0_11 = arith.constant 0 : index
    %c0_12 = arith.constant 0 : index
    %6 = vector.load %arg8[%c0_11, %c0_12] : memref<1x128xf32, #tpu.memory_space<vmem>>, vector<1x128xf32>
    %c0_13 = arith.constant 0 : index
    %c0_14 = arith.constant 0 : index
    %c0_15 = arith.constant 0 : index
    %7 = vector.load %arg1[%c0_13, %c0_14, %c0_15] : memref<2x3x512xbf16, #tpu.memory_space<vmem>>, vector<1x3x512xbf16>
    %8 = vector.shape_cast %7 : vector<1x3x512xbf16> to vector<3x512xbf16>
    %9 = vector.extract_strided_slice %8 {offsets = [0, 0], sizes = [3, 384], strides = [1, 1]} : vector<3x512xbf16> to vector<3x384xbf16>
    %10 = vector.extract_strided_slice %2 {offsets = [0, 0], sizes = [8, 3], strides = [1, 1]} : vector<72x3xbf16> to vector<8x3xbf16>
    %cst = arith.constant dense<0.000000e+00> : vector<8x384xf32>
    %11 = tpu.matmul %10, %9, %cst {dimension_numbers = #tpu.dot_dimension_numbers<[1], [0], [0], [1], [0, 0, 1, 1], [], []>} : vector<8x3xbf16>, vector<3x384xbf16>, vector<8x384xf32> -> vector<8x384xf32>
    %12 = vector.extract_strided_slice %8 {offsets = [0, 1], sizes = [3, 384], strides = [1, 1]} : vector<3x512xbf16> to vector<3x384xbf16>
    %13 = vector.extract_strided_slice %2 {offsets = [8, 0], sizes = [8, 3], strides = [1, 1]} : vector<72x3xbf16> to vector<8x3xbf16>
    %cst_16 = arith.constant dense<0.000000e+00> : vector<8x384xf32>
    %14 = tpu.matmul %13, %12, %cst_16 {dimension_numbers = #tpu.dot_dimension_numbers<[1], [0], [0], [1], [0, 0, 1, 1], [], []>} : vector<8x3xbf16>, vector<3x384xbf16>, vector<8x384xf32> -> vector<8x384xf32>
    %15 = arith.addf %11, %14 : vector<8x384xf32>
    %16 = vector.extract_strided_slice %8 {offsets = [0, 2], sizes = [3, 384], strides = [1, 1]} : vector<3x512xbf16> to vector<3x384xbf16>
    %17 = vector.extract_strided_slice %2 {offsets = [16, 0], sizes = [8, 3], strides = [1, 1]} : vector<72x3xbf16> to vector<8x3xbf16>
    %cst_17 = arith.constant dense<0.000000e+00> : vector<8x384xf32>
    %18 = tpu.matmul %17, %16, %cst_17 {dimension_numbers = #tpu.dot_dimension_numbers<[1], [0], [0], [1], [0, 0, 1, 1], [], []>} : vector<8x3xbf16>, vector<3x384xbf16>, vector<8x384xf32> -> vector<8x384xf32>
    %19 = arith.addf %15, %18 : vector<8x384xf32>
    %20 = vector.extract_strided_slice %8 {offsets = [0, 18], sizes = [3, 384], strides = [1, 1]} : vector<3x512xbf16> to vector<3x384xbf16>
    %21 = vector.extract_strided_slice %2 {offsets = [24, 0], sizes = [8, 3], strides = [1, 1]} : vector<72x3xbf16> to vector<8x3xbf16>
    %cst_18 = arith.constant dense<0.000000e+00> : vector<8x384xf32>
    %22 = tpu.matmul %21, %20, %cst_18 {dimension_numbers = #tpu.dot_dimension_numbers<[1], [0], [0], [1], [0, 0, 1, 1], [], []>} : vector<8x3xbf16>, vector<3x384xbf16>, vector<8x384xf32> -> vector<8x384xf32>
    %23 = arith.addf %19, %22 : vector<8x384xf32>
    %24 = vector.extract_strided_slice %8 {offsets = [0, 19], sizes = [3, 384], strides = [1, 1]} : vector<3x512xbf16> to vector<3x384xbf16>
    %25 = vector.extract_strided_slice %2 {offsets = [32, 0], sizes = [8, 3], strides = [1, 1]} : vector<72x3xbf16> to vector<8x3xbf16>
    %cst_19 = arith.constant dense<0.000000e+00> : vector<8x384xf32>
    %26 = tpu.matmul %25, %24, %cst_19 {dimension_numbers = #tpu.dot_dimension_numbers<[1], [0], [0], [1], [0, 0, 1, 1], [], []>} : vector<8x3xbf16>, vector<3x384xbf16>, vector<8x384xf32> -> vector<8x384xf32>
    %27 = arith.addf %23, %26 : vector<8x384xf32>
    %28 = vector.extract_strided_slice %8 {offsets = [0, 20], sizes = [3, 384], strides = [1, 1]} : vector<3x512xbf16> to vector<3x384xbf16>
    %29 = vector.extract_strided_slice %2 {offsets = [40, 0], sizes = [8, 3], strides = [1, 1]} : vector<72x3xbf16> to vector<8x3xbf16>
    %cst_20 = arith.constant dense<0.000000e+00> : vector<8x384xf32>
    %30 = tpu.matmul %29, %28, %cst_20 {dimension_numbers = #tpu.dot_dimension_numbers<[1], [0], [0], [1], [0, 0, 1, 1], [], []>} : vector<8x3xbf16>, vector<3x384xbf16>, vector<8x384xf32> -> vector<8x384xf32>
    %31 = arith.addf %27, %30 : vector<8x384xf32>
    %32 = vector.extract_strided_slice %8 {offsets = [0, 36], sizes = [3, 384], strides = [1, 1]} : vector<3x512xbf16> to vector<3x384xbf16>
    %33 = vector.extract_strided_slice %2 {offsets = [48, 0], sizes = [8, 3], strides = [1, 1]} : vector<72x3xbf16> to vector<8x3xbf16>
    %cst_21 = arith.constant dense<0.000000e+00> : vector<8x384xf32>
    %34 = tpu.matmul %33, %32, %cst_21 {dimension_numbers = #tpu.dot_dimension_numbers<[1], [0], [0], [1], [0, 0, 1, 1], [], []>} : vector<8x3xbf16>, vector<3x384xbf16>, vector<8x384xf32> -> vector<8x384xf32>
    %35 = arith.addf %31, %34 : vector<8x384xf32>
    %36 = vector.extract_strided_slice %8 {offsets = [0, 37], sizes = [3, 384], strides = [1, 1]} : vector<3x512xbf16> to vector<3x384xbf16>
    %37 = vector.extract_strided_slice %2 {offsets = [56, 0], sizes = [8, 3], strides = [1, 1]} : vector<72x3xbf16> to vector<8x3xbf16>
    %cst_22 = arith.constant dense<0.000000e+00> : vector<8x384xf32>
    %38 = tpu.matmul %37, %36, %cst_22 {dimension_numbers = #tpu.dot_dimension_numbers<[1], [0], [0], [1], [0, 0, 1, 1], [], []>} : vector<8x3xbf16>, vector<3x384xbf16>, vector<8x384xf32> -> vector<8x384xf32>
    %39 = arith.addf %35, %38 : vector<8x384xf32>
    %40 = vector.extract_strided_slice %8 {offsets = [0, 38], sizes = [3, 384], strides = [1, 1]} : vector<3x512xbf16> to vector<3x384xbf16>
    %41 = vector.extract_strided_slice %2 {offsets = [64, 0], sizes = [8, 3], strides = [1, 1]} : vector<72x3xbf16> to vector<8x3xbf16>
    %cst_23 = arith.constant dense<0.000000e+00> : vector<8x384xf32>
    %42 = tpu.matmul %41, %40, %cst_23 {dimension_numbers = #tpu.dot_dimension_numbers<[1], [0], [0], [1], [0, 0, 1, 1], [], []>} : vector<8x3xbf16>, vector<3x384xbf16>, vector<8x384xf32> -> vector<8x384xf32>
    %43 = arith.addf %39, %42 : vector<8x384xf32>
    %44 = vector.broadcast %1 : vector<8x1xf32> to vector<8x384xf32>
    %45 = arith.addf %43, %44 : vector<8x384xf32>
    %cst_24 = arith.constant 0.000000e+00 : f32
    %46 = vector.broadcast %cst_24 : f32 to vector<8x384xf32>
    %47 = arith.maximumf %45, %46 : vector<8x384xf32>
    %48 = vector.broadcast %0 : vector<1x384xf32> to vector<8x384xf32>
    %49 = arith.mulf %47, %48 : vector<8x384xf32>
    %cst_25 = arith.constant dense<0.000000e+00> : vector<8xf32>
    %50 = vector.multi_reduction <add>, %49, %cst_25 [1] : vector<8x384xf32> to vector<8xf32>
    %51 = vector.shape_cast %50 : vector<8xf32> to vector<8x1xf32>
    %52 = vector.broadcast %51 : vector<8x1xf32> to vector<8x1024xf32>
    %53 = arith.mulf %52, %3 : vector<8x1024xf32>
    %cst_26 = arith.constant dense<0.000000e+00> : vector<1024xf32>
    %54 = vector.multi_reduction <add>, %53, %cst_26 [0] : vector<8x1024xf32> to vector<1024xf32>
    %55 = vector.shape_cast %54 : vector<1024xf32> to vector<1x1024xf32>
    %56 = arith.addf %55, %4 : vector<1x1024xf32>
    %cst_27 = arith.constant dense<0.000000e+00> : vector<1x128xf32>
    %57 = tpu.matmul %56, %5, %cst_27 {dimension_numbers = #tpu.dot_dimension_numbers<[1], [0], [0], [1], [0, 0, 1, 1], [], []>} : vector<1x1024xf32>, vector<1024x128xf32>, vector<1x128xf32> -> vector<1x128xf32>
    %58 = arith.addf %57, %6 : vector<1x128xf32>
    %c0_28 = arith.constant 0 : index
    %c0_29 = arith.constant 0 : index
    %59 = vector.load %arg9[%c0_28, %c0_29] : memref<2x128xf32, #tpu.memory_space<vmem>>, vector<1x128xf32>
    tpu.vector_store %arg9[%c0_28, %c0_29], %58 {strides = array<i32>} : memref<2x128xf32, #tpu.memory_space<vmem>>, vector<1x128xf32>,
    %c1 = arith.constant 1 : index
    %c0_30 = arith.constant 0 : index
    %c0_31 = arith.constant 0 : index
    %60 = vector.load %arg1[%c1, %c0_30, %c0_31] : memref<2x3x512xbf16, #tpu.memory_space<vmem>>, vector<1x3x512xbf16>
    %61 = vector.shape_cast %60 : vector<1x3x512xbf16> to vector<3x512xbf16>
    %62 = vector.extract_strided_slice %61 {offsets = [0, 0], sizes = [3, 384], strides = [1, 1]} : vector<3x512xbf16> to vector<3x384xbf16>
    %63 = vector.extract_strided_slice %2 {offsets = [0, 0], sizes = [8, 3], strides = [1, 1]} : vector<72x3xbf16> to vector<8x3xbf16>
    %cst_32 = arith.constant dense<0.000000e+00> : vector<8x384xf32>
    %64 = tpu.matmul %63, %62, %cst_32 {dimension_numbers = #tpu.dot_dimension_numbers<[1], [0], [0], [1], [0, 0, 1, 1], [], []>} : vector<8x3xbf16>, vector<3x384xbf16>, vector<8x384xf32> -> vector<8x384xf32>
    %65 = vector.extract_strided_slice %61 {offsets = [0, 1], sizes = [3, 384], strides = [1, 1]} : vector<3x512xbf16> to vector<3x384xbf16>
    %66 = vector.extract_strided_slice %2 {offsets = [8, 0], sizes = [8, 3], strides = [1, 1]} : vector<72x3xbf16> to vector<8x3xbf16>
    %cst_33 = arith.constant dense<0.000000e+00> : vector<8x384xf32>
    %67 = tpu.matmul %66, %65, %cst_33 {dimension_numbers = #tpu.dot_dimension_numbers<[1], [0], [0], [1], [0, 0, 1, 1], [], []>} : vector<8x3xbf16>, vector<3x384xbf16>, vector<8x384xf32> -> vector<8x384xf32>
    %68 = arith.addf %64, %67 : vector<8x384xf32>
    %69 = vector.extract_strided_slice %61 {offsets = [0, 2], sizes = [3, 384], strides = [1, 1]} : vector<3x512xbf16> to vector<3x384xbf16>
    %70 = vector.extract_strided_slice %2 {offsets = [16, 0], sizes = [8, 3], strides = [1, 1]} : vector<72x3xbf16> to vector<8x3xbf16>
    %cst_34 = arith.constant dense<0.000000e+00> : vector<8x384xf32>
    %71 = tpu.matmul %70, %69, %cst_34 {dimension_numbers = #tpu.dot_dimension_numbers<[1], [0], [0], [1], [0, 0, 1, 1], [], []>} : vector<8x3xbf16>, vector<3x384xbf16>, vector<8x384xf32> -> vector<8x384xf32>
    %72 = arith.addf %68, %71 : vector<8x384xf32>
    %73 = vector.extract_strided_slice %61 {offsets = [0, 18], sizes = [3, 384], strides = [1, 1]} : vector<3x512xbf16> to vector<3x384xbf16>
    %74 = vector.extract_strided_slice %2 {offsets = [24, 0], sizes = [8, 3], strides = [1, 1]} : vector<72x3xbf16> to vector<8x3xbf16>
    %cst_35 = arith.constant dense<0.000000e+00> : vector<8x384xf32>
    %75 = tpu.matmul %74, %73, %cst_35 {dimension_numbers = #tpu.dot_dimension_numbers<[1], [0], [0], [1], [0, 0, 1, 1], [], []>} : vector<8x3xbf16>, vector<3x384xbf16>, vector<8x384xf32> -> vector<8x384xf32>
    %76 = arith.addf %72, %75 : vector<8x384xf32>
    %77 = vector.extract_strided_slice %61 {offsets = [0, 19], sizes = [3, 384], strides = [1, 1]} : vector<3x512xbf16> to vector<3x384xbf16>
    %78 = vector.extract_strided_slice %2 {offsets = [32, 0], sizes = [8, 3], strides = [1, 1]} : vector<72x3xbf16> to vector<8x3xbf16>
    %cst_36 = arith.constant dense<0.000000e+00> : vector<8x384xf32>
    %79 = tpu.matmul %78, %77, %cst_36 {dimension_numbers = #tpu.dot_dimension_numbers<[1], [0], [0], [1], [0, 0, 1, 1], [], []>} : vector<8x3xbf16>, vector<3x384xbf16>, vector<8x384xf32> -> vector<8x384xf32>
    %80 = arith.addf %76, %79 : vector<8x384xf32>
    %81 = vector.extract_strided_slice %61 {offsets = [0, 20], sizes = [3, 384], strides = [1, 1]} : vector<3x512xbf16> to vector<3x384xbf16>
    %82 = vector.extract_strided_slice %2 {offsets = [40, 0], sizes = [8, 3], strides = [1, 1]} : vector<72x3xbf16> to vector<8x3xbf16>
    %cst_37 = arith.constant dense<0.000000e+00> : vector<8x384xf32>
    %83 = tpu.matmul %82, %81, %cst_37 {dimension_numbers = #tpu.dot_dimension_numbers<[1], [0], [0], [1], [0, 0, 1, 1], [], []>} : vector<8x3xbf16>, vector<3x384xbf16>, vector<8x384xf32> -> vector<8x384xf32>
    %84 = arith.addf %80, %83 : vector<8x384xf32>
    %85 = vector.extract_strided_slice %61 {offsets = [0, 36], sizes = [3, 384], strides = [1, 1]} : vector<3x512xbf16> to vector<3x384xbf16>
    %86 = vector.extract_strided_slice %2 {offsets = [48, 0], sizes = [8, 3], strides = [1, 1]} : vector<72x3xbf16> to vector<8x3xbf16>
    %cst_38 = arith.constant dense<0.000000e+00> : vector<8x384xf32>
    %87 = tpu.matmul %86, %85, %cst_38 {dimension_numbers = #tpu.dot_dimension_numbers<[1], [0], [0], [1], [0, 0, 1, 1], [], []>} : vector<8x3xbf16>, vector<3x384xbf16>, vector<8x384xf32> -> vector<8x384xf32>
    %88 = arith.addf %84, %87 : vector<8x384xf32>
    %89 = vector.extract_strided_slice %61 {offsets = [0, 37], sizes = [3, 384], strides = [1, 1]} : vector<3x512xbf16> to vector<3x384xbf16>
    %90 = vector.extract_strided_slice %2 {offsets = [56, 0], sizes = [8, 3], strides = [1, 1]} : vector<72x3xbf16> to vector<8x3xbf16>
    %cst_39 = arith.constant dense<0.000000e+00> : vector<8x384xf32>
    %91 = tpu.matmul %90, %89, %cst_39 {dimension_numbers = #tpu.dot_dimension_numbers<[1], [0], [0], [1], [0, 0, 1, 1], [], []>} : vector<8x3xbf16>, vector<3x384xbf16>, vector<8x384xf32> -> vector<8x384xf32>
    %92 = arith.addf %88, %91 : vector<8x384xf32>
    %93 = vector.extract_strided_slice %61 {offsets = [0, 38], sizes = [3, 384], strides = [1, 1]} : vector<3x512xbf16> to vector<3x384xbf16>
    %94 = vector.extract_strided_slice %2 {offsets = [64, 0], sizes = [8, 3], strides = [1, 1]} : vector<72x3xbf16> to vector<8x3xbf16>
    %cst_40 = arith.constant dense<0.000000e+00> : vector<8x384xf32>
    %95 = tpu.matmul %94, %93, %cst_40 {dimension_numbers = #tpu.dot_dimension_numbers<[1], [0], [0], [1], [0, 0, 1, 1], [], []>} : vector<8x3xbf16>, vector<3x384xbf16>, vector<8x384xf32> -> vector<8x384xf32>
    %96 = arith.addf %92, %95 : vector<8x384xf32>
    %97 = vector.broadcast %1 : vector<8x1xf32> to vector<8x384xf32>
    %98 = arith.addf %96, %97 : vector<8x384xf32>
    %cst_41 = arith.constant 0.000000e+00 : f32
    %99 = vector.broadcast %cst_41 : f32 to vector<8x384xf32>
    %100 = arith.maximumf %98, %99 : vector<8x384xf32>
    %101 = vector.broadcast %0 : vector<1x384xf32> to vector<8x384xf32>
    %102 = arith.mulf %100, %101 : vector<8x384xf32>
    %cst_42 = arith.constant dense<0.000000e+00> : vector<8xf32>
    %103 = vector.multi_reduction <add>, %102, %cst_42 [1] : vector<8x384xf32> to vector<8xf32>
    %104 = vector.shape_cast %103 : vector<8xf32> to vector<8x1xf32>
    %105 = vector.broadcast %104 : vector<8x1xf32> to vector<8x1024xf32>
    %106 = arith.mulf %105, %3 : vector<8x1024xf32>
    %cst_43 = arith.constant dense<0.000000e+00> : vector<1024xf32>
    %107 = vector.multi_reduction <add>, %106, %cst_43 [0] : vector<8x1024xf32> to vector<1024xf32>
    %108 = vector.shape_cast %107 : vector<1024xf32> to vector<1x1024xf32>
    %109 = arith.addf %108, %4 : vector<1x1024xf32>
    %cst_44 = arith.constant dense<0.000000e+00> : vector<1x128xf32>
    %110 = tpu.matmul %109, %5, %cst_44 {dimension_numbers = #tpu.dot_dimension_numbers<[1], [0], [0], [1], [0, 0, 1, 1], [], []>} : vector<1x1024xf32>, vector<1024x128xf32>, vector<1x128xf32> -> vector<1x128xf32>
    %111 = arith.addf %110, %6 : vector<1x128xf32>
    %c1_45 = arith.constant 1 : index
    %c0_46 = arith.constant 0 : index
    %112 = vector.load %arg9[%c1_45, %c0_46] : memref<2x128xf32, #tpu.memory_space<vmem>>, vector<1x128xf32>
    tpu.vector_store %arg9[%c1_45, %c0_46], %111 {strides = array<i32>} : memref<2x128xf32, #tpu.memory_space<vmem>>, vector<1x128xf32>,
    return
  }
  func.func @transform_0(%arg0: i32) -> (i32, i32, i32) {
    %c0_i32 = arith.constant 0 : i32
    %c0_i32_0 = arith.constant 0 : i32
    %c0_i32_1 = arith.constant 0 : i32
    return %arg0, %c0_i32, %c0_i32_0 : i32, i32, i32
  }
  func.func @transform_1(%arg0: i32) -> (i32, i32) {
    %c0_i32 = arith.constant 0 : i32
    %c0_i32_0 = arith.constant 0 : i32
    %c0_i32_1 = arith.constant 0 : i32
    return %c0_i32, %c0_i32_0 : i32, i32
  }
  func.func @transform_2(%arg0: i32) -> (i32, i32) {
    %c0_i32 = arith.constant 0 : i32
    %c0_i32_0 = arith.constant 0 : i32
    %c0_i32_1 = arith.constant 0 : i32
    return %c0_i32, %c0_i32_0 : i32, i32
  }
  func.func @transform_3(%arg0: i32) -> (i32, i32) {
    %c0_i32 = arith.constant 0 : i32
    %c0_i32_0 = arith.constant 0 : i32
    %c0_i32_1 = arith.constant 0 : i32
    return %c0_i32, %c0_i32_0 : i32, i32
  }
  func.func @transform_4(%arg0: i32) -> (i32, i32) {
    %c0_i32 = arith.constant 0 : i32
    %c0_i32_0 = arith.constant 0 : i32
    %c0_i32_1 = arith.constant 0 : i32
    return %c0_i32, %c0_i32_0 : i32, i32
  }
  func.func @transform_5(%arg0: i32) -> (i32, i32) {
    %c0_i32 = arith.constant 0 : i32
    %c0_i32_0 = arith.constant 0 : i32
    %c0_i32_1 = arith.constant 0 : i32
    return %c0_i32, %c0_i32_0 : i32, i32
  }
  func.func @transform_6(%arg0: i32) -> (i32, i32) {
    %c0_i32 = arith.constant 0 : i32
    %c0_i32_0 = arith.constant 0 : i32
    %c0_i32_1 = arith.constant 0 : i32
    return %c0_i32, %c0_i32_0 : i32, i32
  }
  func.func @transform_7(%arg0: i32) -> (i32, i32) {
    %c0_i32 = arith.constant 0 : i32
    %c0_i32_0 = arith.constant 0 : i32
    %c0_i32_1 = arith.constant 0 : i32
    return %c0_i32, %c0_i32_0 : i32, i32
  }
  func.func @transform_8(%arg0: i32) -> (i32, i32) {
    %c0_i32 = arith.constant 0 : i32
    %c0_i32_0 = arith.constant 0 : i32
    return %arg0, %c0_i32 : i32, i32
  }
}

</mosaic_0001>

<bundles_post_ra>
// kernel: _cnn_forward_impl.1
= control target key start
LH: loop header
LB: loop body
LE: loop exit
PB: predicated region body
PF: predicated region fallthrough
CT: control target
= control target key end

     0   :  { %13 = vsyncpa [#allocation3], 0  ;;  %s3668_s27 = smov [#allocation2]   ;;  %s4651_s0 = inlined_call_operand.vmem [shape: bf16[2,3,512], index: 0, kind: input, shape index: {}]   ;;  %s4652_s1 = inlined_call_operand.vmem [shape: f32[1,384], index: 1, kind: input, shape index: {}]   ;;  %s4653_s2 = inlined_call_operand.vmem [shape: bf16[72,3], index: 2, kind: input, shape index: {}]   ;;  %s4654_s3 = inlined_call_operand.vmem [shape: f32[8,1], index: 3, kind: input, shape index: {}]   ;;  %s4655_s4 = inlined_call_operand.vmem [shape: f32[8,1024], index: 4, kind: input, shape index: {}]   ;;  %s4656_s5 = inlined_call_operand.vmem [shape: f32[1,1024], index: 5, kind: input, shape index: {}]   ;;  %s4657_s6 = inlined_call_operand.hbm [shape: f32[1024,128], index: 6, kind: input, shape index: {}]   ;;  %s4658_s7 = inlined_call_operand.vmem [shape: f32[1,128], index: 7, kind: input, shape index: {}]   ;;  %s4659_s8 = inlined_call_operand.vmem [shape: f32[2,128], index: 8, kind: output, shape index: {}]  }
   0x1   :  { %s31_s28 = sshll.u32 %s3668_s27, 4  ;;  %s3644_s9 = scalar_lea.hbm %s4657_s6, 16384  ;;  %s32_s28 = int_to_ptr.vmem [resolvable:$true] %s31_s28 }
   0x2   :  { %p3645_p0 = scmp.ne.s32.totalorder %s4657_s6, %s3644_s9  ;;  %p3648_p1 = scmp.lt.u32.totalorder %s3644_s9, %s4657_s6 }
   0x4   :  { %p3650_p2 = pnand %p3648_p1, %p3645_p0 }
   0x6   :  { %3653 = shalt.err (!%p3650_p2)
}
   0x7   :  { %s3654_s14 = scalar_lea.vmem %s32_s28, 16384  ;;  %p3659_p4 = scmp.lt.s32.totalorder %s32_s28, %s32_s28 }
   0x8   :  { %p3655_p3 = scmp.ne.s32.totalorder %s32_s28, %s3654_s14  ;;  %p3660_p5 = scmp.lt.s32.totalorder %s3654_s14, %s3654_s14 }
   0xa   :  { %p3661_p6 = por %p3660_p5, %p3659_p4 }
   0xc   :  { %p3662_p7 = pnand %p3661_p6, %p3655_p3 }
   0xe   :  { %3665 = shalt.err (!%p3662_p7)
}
   0xf   :  { %s3669_s15 = smov 128   ;;  %s3670_s16 = smov 8  }
  0x10   :  { %37 = dma.hbm_to_vmem [thread:$0]  %s4657_s6, 16384, %s32_s28, [#allocation3], %s3669_s15, %s3669_s15, %s3670_s16  }
  0x11   :  { %3666 = dma.done.wait [#allocation3], 16384  }
  0x12   :  { %3667 = vsyncadd [#allocation3], 4294950912  ;;  %v199_v0 = vlaneseq  ;;  %v3671_v1 = vmov 1983009808   ;;  %v4662_v5 = vmov 0.0   ;;  %v193_v7 = vld [vmem:[%s4651_s0] sm:$0xff] }
  0x13   :  { %v197_v2 = vunpack.c.l.s4 %v3671_v1  ;;  %3246 = vmatprep.subr.bf16.mxu1 %v4662_v5  ;;  %v195_v9 = vcombine.high %v193_v7, %v193_v7  ;;  %vm3673_vm0 = vmmov 0   ;;  %v4660_v10 = vmov 0   ;;  %s3675_s6 = smov 127   ;;  %s3676_s21 = smov 126   ;;  %v45_v14 = vld [vmem:[%s4654_s3] sm:$0xff] }
  0x14   :  { %v3741_v3 = vshrl.u32 %v199_v0, 7  ;;  %3248 = vmatprep.mubr.msk.bf16.mxu1 %vm3673_vm0, %v4662_v5  ;;  %273 = vmatprep.mubr.bf16.mxu0 %v4660_v10  ;;  %s3677_s22 = smov 110   ;;  %s3678_s23 = smov 109   ;;  %vm228_vm1 = vcmask 1040384   ;;  %vm220_vm2 = vcmask 1039360   ;;  %vm229_vm3 = vcmask 1041408  }
  0x15   :  { %v198_v4 = vunpack.c.0.s8 %v197_v2  ;;  %3626 = vset.pattern.permute.xlu0 %v4660_v10  ;;  %s3679_s24 = smov 108   ;;  %s3680_s25 = smov 92   ;;  %v3683_v17 = vmov 65535   ;;  %vm423_vm4 = vcmask 1031168   ;;  %v47_v31 = vld [vmem:[%s4653_s2 + $0x4] sm:$0xf] }
  0x16   :  { %s3681_s26 = smov 91   ;;  %s3682_s27 = smov 90   ;;  %v230_v18 = vsel %vm228_vm1, 4294967295, %v3683_v17  ;;  %vm224_vm5 = vcmask 23552   ;;  %vm531_vm6 = vcmask 900096   ;;  %vm639_vm7 = vcmask 891904  }
  0x17   :  { %v3745_v6 = vsub.s32 %v198_v4, %v3741_v3  ;;  %v3826_v22 = vsel %vm229_vm3, %v230_v18, 0  ;;  %v46_v43 = vld [vmem:[%s4653_s2] sm:$0xf]  ;;  %v48_v54 = vld [vmem:[%s4653_s2 + $0x8] sm:$0xf]  ;;  %vm747_vm8 = vcmask 883712  }
  0x18   :  { %v49_v1 = vld [vmem:[%s4653_s2 + $0xc] sm:$0xf]  ;;  %vm855_vm9 = vcmask 752640   ;;  %vm963_vm10 = vcmask 744448   ;;  %vm1071_vm11 = vcmask 736256  }
  0x19   :  { %v3751_v8 = vrot.slane %v193_v7, %v3745_v6  ;;  %v3764_v12 = vrot.slane %v195_v9, %v3745_v6 }
  0x1b   :  { %212 = vrot.lane.b32.xlu1 %v3751_v8, %s3675_s6  ;;  %v3761_v11 = vcombine.high %v3751_v8, %v3751_v8  ;;  %v211_v13 = vcombine.high %v3764_v12, %v3764_v12  ;;  %v332_v32 = vand.u32 %v3826_v22, %v3764_v12  ;;  %v326_v34 = vand.u32 %v3826_v22, %v3751_v8 }
  0x1d   :  { %214 = vrot.lane.b32.xlu0 %v3761_v11, %s3675_s6  ;;  %v329_v27 = vand.u32 %v3826_v22, %v3761_v11 }
  0x1f   :  { %218 = vrot.lane.b32.xlu1 %v211_v13, %s3675_s6 }
  0x21   :  { %216 = vrot.lane.b32.xlu0 %v3764_v12, %s3675_s6 }
  0x23   :  { %419 = vrot.lane.b32.xlu1 %v3764_v12, %s3676_s21 }
  0x25   :  { %417 = vrot.lane.b32.xlu0 %v3761_v11, %s3676_s21 }
  0x27   :  { %421 = vrot.lane.b32.xlu1 %v211_v13, %s3676_s21 }
  0x29   :  { %415 = vrot.lane.b32.xlu0 %v3751_v8, %s3676_s21 }
  0x2b   :  { %527 = vrot.lane.b32.xlu1 %v3764_v12, %s3677_s22 }
  0x2d   :  { %525 = vrot.lane.b32.xlu0 %v3761_v11, %s3677_s22 }
  0x2f   :  { %529 = vrot.lane.b32.xlu1 %v211_v13, %s3677_s22 }
  0x31   :  { %523 = vrot.lane.b32.xlu0 %v3751_v8, %s3677_s22 }
  0x33   :  { %635 = vrot.lane.b32.xlu1 %v3764_v12, %s3678_s23 }
  0x35   :  { %633 = vrot.lane.b32.xlu0 %v3761_v11, %s3678_s23 }
  0x37   :  { %637 = vrot.lane.b32.xlu1 %v211_v13, %s3678_s23 }
  0x39   :  { %631 = vrot.lane.b32.xlu0 %v3751_v8, %s3678_s23 }
  0x3b   :  { %743 = vrot.lane.b32.xlu1 %v3764_v12, %s3679_s24 }
  0x3d   :  { %741 = vrot.lane.b32.xlu0 %v3761_v11, %s3679_s24 }
  0x3f   :  { %745 = vrot.lane.b32.xlu1 %v211_v13, %s3679_s24 }
  0x41   :  { %739 = vrot.lane.b32.xlu0 %v3751_v8, %s3679_s24 }
  0x43   :  { %851 = vrot.lane.b32.xlu1 %v3764_v12, %s3680_s25 }
  0x45   :  { %849 = vrot.lane.b32.xlu0 %v3761_v11, %s3680_s25 }
  0x47   :  { %853 = vrot.lane.b32.xlu1 %v211_v13, %s3680_s25 }
  0x49   :  { %847 = vrot.lane.b32.xlu0 %v3751_v8, %s3680_s25 }
  0x4b   :  { %959 = vrot.lane.b32.xlu1 %v3764_v12, %s3681_s26 }
  0x4d   :  { %957 = vrot.lane.b32.xlu0 %v3761_v11, %s3681_s26 }
  0x4f   :  { %961 = vrot.lane.b32.xlu1 %v211_v13, %s3681_s26 }
  0x51   :  { %955 = vrot.lane.b32.xlu0 %v3751_v8, %s3681_s26 }
  0x53   :  { %1067 = vrot.lane.b32.xlu1 %v3764_v12, %s3682_s27 }
  0x55   :  { %1065 = vrot.lane.b32.xlu0 %v3761_v11, %s3682_s27 }
  0x57   :  { %1069 = vrot.lane.b32.xlu1 %v211_v13, %s3682_s27 }
  0x59   :  { %1063 = vrot.lane.b32.xlu0 %v3751_v8, %s3682_s27 }
  0x5d   :  { %1173 = vperm.xlu0 %3626, %v45_v14  }
  0x8d   :  { %v213_v15 = vpop.permute.xlu1 %212 }
  0x8f   :  { %v215_v16 = vpop.permute.xlu0 %214 }
  0x90   :  { %v221_v20 = vsel %vm220_vm2, %v213_v15, %v215_v16 }
  0x91   :  { %v219_v19 = vpop.permute.xlu1 %218  ;;  %v233_v29 = vand.u32 %v3826_v22, %v221_v20 }
  0x93   :  { %v217_v21 = vpop.permute.xlu0 %216 }
  0x94   :  { %v223_v23 = vsel %vm220_vm2, %v217_v21, %v219_v19  ;;  %v222_v24 = vsel %vm220_vm2, %v215_v16, %v217_v21  ;;  %v50_v16 = vld [vmem:[%s4653_s2 + $0x10] sm:$0xf] }
  0x95   :  { %v236_v25 = vand.u32 %v3826_v22, %v222_v24  ;;  %v239_v26 = vand.u32 %v3826_v22, %v223_v23  ;;  %v420_v28 = vpop.permute.xlu1 %419 }
  0x97   :  { %241 = vmatprep.subr.bf16.mxu0 %v236_v25  ;;  %3247 = vmatpush3.bf16.msra.mxu1 %v239_v26  ;;  %v418_v30 = vpop.permute.xlu0 %417 }
  0x98   :  { %242 = vmatpush1.bf16.msra.mxu0 %v233_v29  ;;  %v425_v33 = vsel %vm423_vm4, %v418_v30, %v420_v28  ;;  %3252 = vmatprep.subr.bf16.mxu1 %v4662_v5 }
  0x99   :  { %334 = vmatprep.subr.bf16.mxu0 %v329_v27  ;;  %v434_v35 = vand.u32 %v425_v33, %v3826_v22  ;;  %v422_v36 = vpop.permute.xlu1 %421 }
  0x9a   :  { %3249 = vmatmul.mubr.msk.bf16.vlgmr.msra.gmra.mrb[0].mxu1 %vm224_vm5, %v47_v31  ;;  %v426_v38 = vsel %vm423_vm4, %v420_v28, %v422_v36  ;;  %v51_v28 = vld [vmem:[%s4653_s2 + $0x14] sm:$0xf] }
  0x9b   :  { %2893 = vmatmul.mubr.msk.bf16.vlgmr.msra.gmra.mrb[0].mxu0 %vm224_vm5, %v47_v31  ;;  %v416_v37 = vpop.permute.xlu0 %415  ;;  %3253 = vmatpush3.bf16.msra.mxu1 %v332_v32  ;;  %v437_v41 = vand.u32 %v426_v38, %v3826_v22 }
  0x9c   :  { %335 = vmatpush1.bf16.msra.mxu0 %v326_v34  ;;  %3254 = vmatprep.mubr.msk.bf16.mxu1 %vm3673_vm0, %v4662_v5  ;;  %v424_v39 = vsel %vm423_vm4, %v416_v37, %v418_v30 }
  0x9d   :  { %439 = vmatprep.subr.bf16.mxu0 %v434_v35  ;;  %366 = vmatprep.mubr.bf16.mxu0 %v4660_v10  ;;  %v528_v40 = vpop.permute.xlu1 %527  ;;  %v431_v44 = vand.u32 %v424_v39, %v3826_v22  ;;  %v52_v39 = vld [vmem:[%s4653_s2 + $0x18] sm:$0xf] }
  0x9e   :  { %3258 = vmatprep.subr.bf16.mxu1 %v4662_v5 }
  0x9f   :  { %v526_v42 = vpop.permute.xlu0 %525 }
  0xa0   :  { %v533_v45 = vsel %vm531_vm6, %v526_v42, %v528_v40 }
  0xa1   :  { %v542_v46 = vand.u32 %v533_v45, %v3826_v22  ;;  %v530_v47 = vpop.permute.xlu1 %529 }
  0xa2   :  { %3255 = vmatmul.mubr.msk.bf16.vlgmr.msra.gmra.mrb[4].mxu1 %vm224_vm5, %v46_v43  ;;  %v534_v49 = vsel %vm531_vm6, %v528_v40, %v530_v47 }
  0xa3   :  { %2895 = vmatmul.mubr.msk.bf16.vlgmr.msra.gmra.mrb[4].mxu0 %vm224_vm5, %v46_v43  ;;  %3259 = vmatpush3.bf16.msra.mxu1 %v437_v41  ;;  %v524_v48 = vpop.permute.xlu0 %523  ;;  %v545_v52 = vand.u32 %v534_v49, %v3826_v22 }
  0xa4   :  { %440 = vmatpush1.bf16.msra.mxu0 %v431_v44  ;;  %3260 = vmatprep.mubr.msk.bf16.mxu1 %vm3673_vm0, %v4662_v5  ;;  %v532_v50 = vsel %vm531_vm6, %v524_v48, %v526_v42  ;;  %v53_v48 = vld [vmem:[%s4653_s2 + $0x1c] sm:$0xf] }
  0xa5   :  { %547 = vmatprep.subr.bf16.mxu0 %v542_v46  ;;  %471 = vmatprep.mubr.bf16.mxu0 %v4660_v10  ;;  %v636_v51 = vpop.permute.xlu1 %635  ;;  %v539_v55 = vand.u32 %v532_v50, %v3826_v22  ;;  %v54_v50 = vld [vmem:[%s4653_s2 + $0x20] sm:$0xf] }
  0xa6   :  { %3264 = vmatprep.subr.bf16.mxu1 %v4662_v5 }
  0xa7   :  { %v634_v53 = vpop.permute.xlu0 %633 }
  0xa8   :  { %v641_v56 = vsel %vm639_vm7, %v634_v53, %v636_v51 }
  0xa9   :  { %v650_v57 = vand.u32 %v641_v56, %v3826_v22  ;;  %v638_v58 = vpop.permute.xlu1 %637 }
  0xaa   :  { %3261 = vmatmul.mubr.msk.bf16.vlgmr.msra.gmra.mrb[8].mxu1 %vm224_vm5, %v48_v54  ;;  %v642_v60 = vsel %vm639_vm7, %v636_v51, %v638_v58  ;;  %v2911_v51 = vld [vmem:[%s4651_s0 + $0x8] sm:$0xff] }
  0xab   :  { %2897 = vmatmul.mubr.msk.bf16.vlgmr.msra.gmra.mrb[8].mxu0 %vm224_vm5, %v48_v54  ;;  %3265 = vmatpush3.bf16.msra.mxu1 %v545_v52  ;;  %v632_v59 = vpop.permute.xlu0 %631  ;;  %v653_v63 = vand.u32 %v642_v60, %v3826_v22  ;;  %v3962_v52 = vrot.slane %v2911_v51, %v3745_v6  ;;  %v1594_v54 = vcombine.high %v2911_v51, %v2911_v51  ;;  %v81_v58 = vld [vmem:[#allocation2 + $0x88] sm:$0xff] }
  0xac   :  { %548 = vmatpush1.bf16.msra.mxu0 %v539_v55  ;;  %3266 = vmatprep.mubr.msk.bf16.mxu1 %vm3673_vm0, %v4662_v5  ;;  %v640_v61 = vsel %vm639_vm7, %v632_v59, %v634_v53  ;;  %v112_v59 = vld [vmem:[#allocation2 + $0x180] sm:$0xff] }
  0xad   :  { %655 = vmatprep.subr.bf16.mxu0 %v650_v57  ;;  %579 = vmatprep.mubr.bf16.mxu0 %v4660_v10  ;;  %v744_v62 = vpop.permute.xlu1 %743  ;;  %v647_v2 = vand.u32 %v640_v61, %v3826_v22  ;;  %v3966_v53 = vcombine.high %v3962_v52, %v3962_v52  ;;  %v3971_v55 = vrot.slane %v1594_v54, %v3745_v6  ;;  %v80_v57 = vld [vmem:[#allocation2 + $0x80] sm:$0xff]  ;;  %v87_v54 = vld [vmem:[#allocation2 + $0xb8] sm:$0xff] }
  0xae   :  { %3270 = vmatprep.subr.bf16.mxu1 %v4662_v5 }
  0xaf   :  { %v742_v0 = vpop.permute.xlu0 %741  ;;  %1613 = vrot.lane.b32.xlu0 %v3966_v53, %s3675_s6  ;;  %v3979_v56 = vcombine.high %v3971_v55, %v3971_v55 }
  0xb0   :  { %v749_v4 = vsel %vm747_vm8, %v742_v0, %v744_v62 }
  0xb1   :  { %v758_v7 = vand.u32 %v749_v4, %v3826_v22  ;;  %v746_v8 = vpop.permute.xlu1 %745 }
  0xb2   :  { %3267 = vmatmul.mubr.msk.bf16.vlgmr.msra.gmra.mrb[12].mxu1 %vm224_vm5, %v49_v1  ;;  %v750_v11 = vsel %vm747_vm8, %v744_v62, %v746_v8  ;;  %v4001_v62 = vpack.c.bf16 %v81_v58, %v80_v57  ;;  %v119_v57 = vld [vmem:[#allocation2 + $0x1b8] sm:$0xff] }
  0xb3   :  { %2899 = vmatmul.mubr.msk.bf16.vlgmr.msra.gmra.mrb[12].mxu0 %vm224_vm5, %v49_v1  ;;  %3271 = vmatpush3.bf16.msra.mxu1 %v653_v63  ;;  %v740_v9 = vpop.permute.xlu0 %739  ;;  %v761_v14 = vand.u32 %v750_v11, %v3826_v22  ;;  %v113_v63 = vld [vmem:[#allocation2 + $0x188] sm:$0xff] }
  0xb4   :  { %656 = vmatpush1.bf16.msra.mxu0 %v647_v2  ;;  %3272 = vmatprep.mubr.msk.bf16.mxu1 %vm3673_vm0, %v4662_v5  ;;  %v748_v12 = vsel %vm747_vm8, %v740_v9, %v742_v0  ;;  %v64_v0 = vld [vmem:[#allocation2] sm:$0xff]  ;;  %v65_v1 = vld [vmem:[#allocation2 + $0x8] sm:$0xff] }
  0xb5   :  { %763 = vmatprep.subr.bf16.mxu0 %v758_v7  ;;  %687 = vmatprep.mubr.bf16.mxu0 %v4660_v10  ;;  %v852_v13 = vpop.permute.xlu1 %851  ;;  %v755_v17 = vand.u32 %v748_v12, %v3826_v22  ;;  %v4003_v7 = vpack.c.bf16 %v113_v63, %v112_v59  ;;  %v4005_v8 = vpack.c.bf16 %v65_v1, %v64_v0  ;;  %v96_v9 = vld [vmem:[#allocation2 + $0x100] sm:$0xff]  ;;  %v97_v11 = vld [vmem:[#allocation2 + $0x108] sm:$0xff]  ;;  %v71_v63 = vld [vmem:[#allocation2 + $0x38] sm:$0xff] }
  0xb6   :  { %3276 = vmatprep.subr.bf16.mxu1 %v4662_v5  ;;  %1615 = vrot.lane.b32.xlu0 %v3971_v55, %s3675_s6  ;;  %v102_v0 = vld [vmem:[#allocation2 + $0x130] sm:$0xff] }
  0xb7   :  { %v850_v15 = vpop.permute.xlu0 %849 }
  0xb8   :  { %v857_v18 = vsel %vm855_vm9, %v850_v15, %v852_v13 }
  0xb9   :  { %v866_v19 = vand.u32 %v857_v18, %v3826_v22  ;;  %v854_v20 = vpop.permute.xlu1 %853  ;;  %v114_v18 = vld [vmem:[#allocation2 + $0x190] sm:$0xff] }
  0xba   :  { %3273 = vmatmul.mubr.msk.bf16.vlgmr.msra.gmra.mrb[16].mxu1 %vm224_vm5, %v50_v16  ;;  %v858_v23 = vsel %vm855_vm9, %v852_v13, %v854_v20  ;;  %1611 = vrot.lane.b32.xlu0 %v3962_v52, %s3675_s6  ;;  %v115_v20 = vld [vmem:[#allocation2 + $0x198] sm:$0xff] }
  0xbb   :  { %2901 = vmatmul.mubr.msk.bf16.vlgmr.msra.gmra.mrb[16].mxu0 %vm224_vm5, %v50_v16  ;;  %3277 = vmatpush3.bf16.msra.mxu1 %v761_v14  ;;  %v848_v21 = vpop.permute.xlu0 %847  ;;  %v869_v26 = vand.u32 %v858_v23, %v3826_v22  ;;  %v4008_v14 = vpack.c.bf16 %v97_v11, %v96_v9  ;;  %v82_v16 = vld [vmem:[#allocation2 + $0x90] sm:$0xff]  ;;  %v67_v23 = vld [vmem:[#allocation2 + $0x18] sm:$0xff] }
  0xbc   :  { %764 = vmatpush1.bf16.msra.mxu0 %v755_v17  ;;  %3278 = vmatprep.mubr.msk.bf16.mxu1 %vm3673_vm0, %v4662_v5  ;;  %v856_v24 = vsel %vm855_vm9, %v848_v21, %v850_v15  ;;  %v83_v17 = vld [vmem:[#allocation2 + $0x98] sm:$0xff]  ;;  %v66_v21 = vld [vmem:[#allocation2 + $0x10] sm:$0xff] }
  0xbd   :  { %871 = vmatprep.subr.bf16.mxu0 %v866_v19  ;;  %795 = vmatprep.mubr.bf16.mxu0 %v4660_v10  ;;  %v960_v25 = vpop.permute.xlu1 %959  ;;  %v863_v29 = vand.u32 %v856_v24, %v3826_v22  ;;  %v4015_v19 = vpack.c.bf16 %v83_v17, %v82_v16  ;;  %v4017_v24 = vpack.c.bf16 %v115_v20, %v114_v18 }
  0xbe   :  { %3282 = vmatprep.subr.bf16.mxu1 %v4662_v5  ;;  %1617 = vrot.lane.b32.xlu0 %v3979_v56, %s3675_s6 }
  0xbf   :  { %v958_v27 = vpop.permute.xlu0 %957 }
  0xc0   :  { %v965_v30 = vsel %vm963_vm10, %v958_v27, %v960_v25 }
  0xc1   :  { %v974_v31 = vand.u32 %v965_v30, %v3826_v22  ;;  %v962_v32 = vpop.permute.xlu1 %961  ;;  %v84_v30 = vld [vmem:[#allocation2 + $0xa0] sm:$0xff] }
  0xc2   :  { %3279 = vmatmul.mubr.msk.bf16.vlgmr.msra.gmra.mrb[20].mxu1 %vm224_vm5, %v51_v28  ;;  %v966_v34 = vsel %vm963_vm10, %v960_v25, %v962_v32  ;;  %1804 = vrot.lane.b32.xlu0 %v3966_v53, %s3676_s21  ;;  %v4019_v25 = vpack.c.bf16 %v67_v23, %v66_v21  ;;  %v116_v32 = vld [vmem:[#allocation2 + $0x1a0] sm:$0xff] }
  0xc3   :  { %2903 = vmatmul.mubr.msk.bf16.vlgmr.msra.gmra.mrb[20].mxu0 %vm224_vm5, %v51_v28  ;;  %3283 = vmatpush3.bf16.msra.mxu1 %v869_v26  ;;  %v956_v33 = vpop.permute.xlu0 %955  ;;  %v977_v37 = vand.u32 %v966_v34, %v3826_v22  ;;  %v98_v26 = vld [vmem:[#allocation2 + $0x110] sm:$0xff] }
  0xc4   :  { %872 = vmatpush1.bf16.msra.mxu0 %v863_v29  ;;  %3284 = vmatprep.mubr.msk.bf16.mxu1 %vm3673_vm0, %v4662_v5  ;;  %v964_v35 = vsel %vm963_vm10, %v956_v33, %v958_v27  ;;  %v99_v27 = vld [vmem:[#allocation2 + $0x118] sm:$0xff] }
  0xc5   :  { %979 = vmatprep.subr.bf16.mxu0 %v974_v31  ;;  %903 = vmatprep.mubr.bf16.mxu0 %v4660_v10  ;;  %v1068_v36 = vpop.permute.xlu1 %1067  ;;  %v971_v40 = vand.u32 %v964_v35, %v3826_v22  ;;  %v4022_v28 = vpack.c.bf16 %v99_v27, %v98_v26  ;;  %v85_v31 = vld [vmem:[#allocation2 + $0xa8] sm:$0xff] }
  0xc6   :  { %3288 = vmatprep.subr.bf16.mxu1 %v4662_v5  ;;  %1806 = vrot.lane.b32.xlu0 %v3971_v55, %s3676_s21 }
  0xc7   :  { %v1066_v38 = vpop.permute.xlu0 %1065 }
  0xc8   :  { %v1073_v41 = vsel %vm1071_vm11, %v1066_v38, %v1068_v36 }
  0xc9   :  { %v1082_v42 = vand.u32 %v1073_v41, %v3826_v22  ;;  %v1070_v43 = vpop.permute.xlu1 %1069 }
  0xca   :  { %3285 = vmatmul.mubr.msk.bf16.vlgmr.msra.gmra.mrb[24].mxu1 %vm224_vm5, %v52_v39  ;;  %v1074_v45 = vsel %vm1071_vm11, %v1068_v36, %v1070_v43  ;;  %1802 = vrot.lane.b32.xlu0 %v3962_v52, %s3676_s21  ;;  %v4029_v36 = vpack.c.bf16 %v85_v31, %v84_v30 }
  0xcb   :  { %2905 = vmatmul.mubr.msk.bf16.vlgmr.msra.gmra.mrb[24].mxu0 %vm224_vm5, %v52_v39  ;;  %3289 = vmatpush3.bf16.msra.mxu1 %v977_v37  ;;  %v1064_v44 = vpop.permute.xlu0 %1063  ;;  %v1085_v47 = vand.u32 %v1074_v45, %v3826_v22  ;;  %v117_v37 = vld [vmem:[#allocation2 + $0x1a8] sm:$0xff]  ;;  %v100_v45 = vld [vmem:[#allocation2 + $0x120] sm:$0xff] }
  0xcc   :  { %980 = vmatpush1.bf16.msra.mxu0 %v971_v40  ;;  %3290 = vmatprep.mubr.msk.bf16.mxu1 %vm3673_vm0, %v4662_v5  ;;  %v1072_v46 = vsel %vm1071_vm11, %v1064_v44, %v1066_v38  ;;  %v68_v38 = vld [vmem:[#allocation2 + $0x20] sm:$0xff]  ;;  %v69_v39 = vld [vmem:[#allocation2 + $0x28] sm:$0xff]  ;;  %v4031_v43 = vpack.c.bf16 %v117_v37, %v116_v32 }
  0xcd   :  { %1087 = vmatprep.subr.bf16.mxu0 %v1082_v42  ;;  %1011 = vmatprep.mubr.bf16.mxu0 %v4660_v10  ;;  %v1079_v49 = vand.u32 %v1072_v46, %v3826_v22  ;;  %v4033_v44 = vpack.c.bf16 %v69_v39, %v68_v38  ;;  %v101_v46 = vld [vmem:[#allocation2 + $0x128] sm:$0xff] }
  0xce   :  { %3294 = vmatprep.subr.bf16.mxu1 %v4662_v5  ;;  %1808 = vrot.lane.b32.xlu0 %v3979_v56, %s3676_s21  ;;  %v4036_v51 = vpack.c.bf16 %v101_v46, %v100_v45 }
  0xd2   :  { %3291 = vmatmul.mubr.msk.bf16.vlgmr.msra.gmra.mrb[28].mxu1 %vm224_vm5, %v53_v48  ;;  %1910 = vrot.lane.b32.xlu0 %v3971_v55, %s3677_s22 }
  0xd3   :  { %2907 = vmatmul.mubr.msk.bf16.vlgmr.msra.gmra.mrb[28].mxu0 %vm224_vm5, %v53_v48  ;;  %3295 = vmatpush3.bf16.msra.mxu1 %v1085_v47  ;;  %v86_v47 = vld [vmem:[#allocation2 + $0xb0] sm:$0xff] }
  0xd4   :  { %1088 = vmatpush1.bf16.msra.mxu0 %v1079_v49  ;;  %3296 = vmatprep.mubr.msk.bf16.mxu1 %vm3673_vm0, %v4662_v5  ;;  %v4040_v59 = vpack.c.bf16 %v87_v54, %v86_v47 }
  0xd5   :  { %1119 = vmatprep.mubr.bf16.mxu0 %v4660_v10  ;;  %3355 = vmatprep.subr.bf16.mxu0 %v4001_v62 }
  0xd6   :  { %1906 = vrot.lane.b32.xlu0 %v3962_v52, %s3677_s22  ;;  %3387 = vmatprep.subr.bf16.mxu1 %v4003_v7 }
  0xda   :  { %3297 = vmatmul.mubr.msk.bf16.vlgmr.msra.gmra.mrb[32].mxu1 %vm224_vm5, %v54_v50  ;;  %1912 = vrot.lane.b32.xlu0 %v3979_v56, %s3677_s22 }
  0xdb   :  { %2909 = vmatmul.mubr.msk.bf16.vlgmr.msra.gmra.mrb[32].mxu0 %vm224_vm5, %v54_v50  ;;  %3389 = vmatpush3.bf16.msra.mxu1 %v4008_v14 }
  0xdc   :  { %3357 = vmatpush3.bf16.msra.mxu0 %v4005_v8  ;;  %3391 = vmatprep.subr.bf16.mxu1 %v4017_v24 }
  0xdd   :  { %3359 = vmatprep.subr.bf16.mxu0 %v4015_v19 }
  0xde   :  { %2012 = vrot.lane.b32.xlu0 %v3966_v53, %s3678_s23 }
  0xdf   :  { %3393 = vmatpush3.bf16.msra.mxu1 %v4022_v28 }
  0xe0   :  { %3361 = vmatpush3.bf16.msra.mxu0 %v4019_v25  ;;  %3395 = vmatprep.subr.bf16.mxu1 %v4031_v43 }
  0xe1   :  { %3363 = vmatprep.subr.bf16.mxu0 %v4029_v36 }
  0xe2   :  { %2010 = vrot.lane.b32.xlu0 %v3962_v52, %s3678_s23 }
  0xe3   :  { %3397 = vmatpush3.bf16.msra.mxu1 %v4036_v51 }
  0xe4   :  { %3365 = vmatpush3.bf16.msra.mxu0 %v4033_v44 }
  0xe5   :  { %3367 = vmatprep.subr.bf16.mxu0 %v4040_v59 }
  0xe6   :  { %2116 = vrot.lane.b32.xlu0 %v3966_v53, %s3679_s24 }
  0xea   :  { %2114 = vrot.lane.b32.xlu0 %v3962_v52, %s3679_s24 }
  0xee   :  { %2220 = vrot.lane.b32.xlu0 %v3966_v53, %s3680_s25 }
  0xf2   :  { %2218 = vrot.lane.b32.xlu0 %v3962_v52, %s3680_s25 }
  0xf6   :  { %2324 = vrot.lane.b32.xlu0 %v3966_v53, %s3681_s26 }
  0xfa   :  { %2322 = vrot.lane.b32.xlu0 %v3962_v52, %s3681_s26 }
  0xfe   :  { %2428 = vrot.lane.b32.xlu0 %v3966_v53, %s3682_s27 }
 0x102   :  { %2426 = vrot.lane.b32.xlu0 %v3962_v52, %s3682_s27 }
 0x16d   :  { %v316_v6 = vpop.f32.mrb[0].mxu1 }
 0x16e   :  { %v275_v60 = vpop.f32.mrb[0].mxu0  ;;  %v3250_v61 = vpop.f32.mrb[1].mxu1 }
 0x16f   :  { %v277_v2 = vpop.f32.mrb[1].mxu0  ;;  %v319_v4 = vpop.f32.mrb[2].mxu1  ;;  %v70_v61 = vld [vmem:[#allocation2 + $0x30] sm:$0xff] }
 0x170   :  { %v279_v12 = vpop.f32.mrb[2].mxu0  ;;  %v3251_v13 = vpop.f32.mrb[3].mxu1  ;;  %v4047_v1 = vpack.c.bf16 %v71_v63, %v70_v61 }
 0x171   :  { %v280_v15 = vpop.f32.mrb[3].mxu0 }
 0x172   :  { %3369 = vmatpush3.bf16.msra.mxu0 %v4047_v1 }
 0x175   :  { %v409_v29 = vpop.f32.mrb[4].mxu1 }
 0x176   :  { %v410_v33 = vadd.f32 %v409_v29, %v316_v6  ;;  %v368_v34 = vpop.f32.mrb[4].mxu0  ;;  %v3256_v35 = vpop.f32.mrb[5].mxu1  ;;  %v118_v6 = vld [vmem:[#allocation2 + $0x1b0] sm:$0xff] }
 0x177   :  { %v369_v40 = vadd.f32 %v368_v34, %v275_v60  ;;  %v370_v41 = vpop.f32.mrb[5].mxu0  ;;  %v412_v42 = vpop.f32.mrb[6].mxu1  ;;  %v4042_v60 = vpack.c.bf16 %v119_v57, %v118_v6 }
 0x178   :  { %v371_v48 = vadd.f32 %v370_v41, %v277_v2  ;;  %v372_v49 = vpop.f32.mrb[6].mxu0  ;;  %v3257_v50 = vpop.f32.mrb[7].mxu1  ;;  %v103_v2 = vld [vmem:[#allocation2 + $0x138] sm:$0xff] }
 0x179   :  { %v373_v58 = vpop.f32.mrb[7].mxu0  ;;  %3399 = vmatprep.subr.bf16.mxu1 %v4042_v60  ;;  %v4051_v4 = vpack.c.bf16 %v103_v2, %v102_v0 }
 0x17b   :  { %4712 = vst [vmem:[#allocation5_spill] sm:$0xff] %v4051_v4  ;;  %3401 = vmatpush3.bf16.msra.mxu1 %v4051_v4 }
 0x17d   :  { %v514_v9 = vpop.f32.mrb[8].mxu1 }
 0x17e   :  { %v522_v11 = vadd.f32 %v514_v9, %v410_v33  ;;  %v473_v12 = vpop.f32.mrb[8].mxu0  ;;  %v3262_v13 = vpop.f32.mrb[9].mxu1 }
 0x17f   :  { %v520_v15 = vadd.f32 %v473_v12, %v369_v40  ;;  %v475_v16 = vpop.f32.mrb[9].mxu0  ;;  %v517_v17 = vpop.f32.mrb[10].mxu1 }
 0x180   :  { %v521_v18 = vadd.f32 %v475_v16, %v371_v48  ;;  %v477_v20 = vpop.f32.mrb[10].mxu0  ;;  %v3263_v21 = vpop.f32.mrb[11].mxu1 }
 0x181   :  { %v478_v23 = vpop.f32.mrb[11].mxu0 }
 0x185   :  { %v622_v26 = vpop.f32.mrb[12].mxu1 }
 0x186   :  { %v630_v27 = vadd.f32 %v622_v26, %v522_v11  ;;  %v581_v29 = vpop.f32.mrb[12].mxu0  ;;  %v3268_v30 = vpop.f32.mrb[13].mxu1 }
 0x187   :  { %v628_v31 = vadd.f32 %v581_v29, %v520_v15  ;;  %v583_v32 = vpop.f32.mrb[13].mxu0  ;;  %v625_v33 = vpop.f32.mrb[14].mxu1 }
 0x188   :  { %v629_v34 = vadd.f32 %v583_v32, %v521_v18  ;;  %v585_v35 = vpop.f32.mrb[14].mxu0  ;;  %v3269_v37 = vpop.f32.mrb[15].mxu1 }
 0x189   :  { %v586_v38 = vpop.f32.mrb[15].mxu0 }
 0x18d   :  { %v730_v39 = vpop.f32.mrb[16].mxu1 }
 0x18e   :  { %v738_v40 = vadd.f32 %v730_v39, %v630_v27  ;;  %v689_v41 = vpop.f32.mrb[16].mxu0  ;;  %v3274_v42 = vpop.f32.mrb[17].mxu1 }
 0x18f   :  { %v736_v45 = vadd.f32 %v689_v41, %v628_v31  ;;  %v691_v46 = vpop.f32.mrb[17].mxu0  ;;  %v733_v47 = vpop.f32.mrb[18].mxu1 }
 0x190   :  { %v737_v48 = vadd.f32 %v691_v46, %v629_v34  ;;  %v693_v49 = vpop.f32.mrb[18].mxu0  ;;  %v3275_v50 = vpop.f32.mrb[19].mxu1  ;;  %v4665_v47 = vsub.s32 0, %v3741_v3 }
 0x191   :  { %v694_v54 = vpop.f32.mrb[19].mxu0  ;;  %v4065_v46 = vpop.permute.xlu0 %1173 }
 0x192   :  { %4713 = vst [vmem:[#allocation6_spill] sm:$0xff] %v4065_v46  ;;  %v44_v54 = vld [vmem:[%s4652_s1] sm:$0x7] }
 0x195   :  { %v838_v6 = vpop.f32.mrb[20].mxu1 }
 0x196   :  { %v846_v57 = vadd.f32 %v838_v6, %v738_v40  ;;  %v797_v58 = vpop.f32.mrb[20].mxu0  ;;  %v3280_v61 = vpop.f32.mrb[21].mxu1  ;;  %v4666_v6 = vsub.s32 1, %v3741_v3 }
 0x197   :  { %v844_v63 = vadd.f32 %v797_v58, %v736_v45  ;;  %v799_v0 = vpop.f32.mrb[21].mxu0  ;;  %v841_v2 = vpop.f32.mrb[22].mxu1 }
 0x198   :  { %v845_v9 = vadd.f32 %v799_v0, %v737_v48  ;;  %v801_v11 = vpop.f32.mrb[22].mxu0  ;;  %v3281_v12 = vpop.f32.mrb[23].mxu1 }
 0x199   :  { %v802_v13 = vpop.f32.mrb[23].mxu0  ;;  %v4664_v11 = vsub.s32 2, %v3741_v3 }
 0x19d   :  { %v946_v15 = vpop.f32.mrb[24].mxu1 }
 0x19e   :  { %v954_v16 = vadd.f32 %v946_v15, %v846_v57  ;;  %v905_v17 = vpop.f32.mrb[24].mxu0  ;;  %v3286_v18 = vpop.f32.mrb[25].mxu1  ;;  %v4077_v15 = vrot.slane %v44_v54, %v4665_v47 }
 0x19f   :  { %v952_v20 = vadd.f32 %v905_v17, %v844_v63  ;;  %v907_v21 = vpop.f32.mrb[25].mxu0  ;;  %v949_v23 = vpop.f32.mrb[26].mxu1  ;;  %v4082_v17 = vrot.slane %v44_v54, %v4666_v6 }
 0x1a0   :  { %v953_v26 = vadd.f32 %v907_v21, %v845_v9  ;;  %v909_v27 = vpop.f32.mrb[26].mxu0  ;;  %v3287_v29 = vpop.f32.mrb[27].mxu1  ;;  %4714 = vst [vmem:[#allocation7_spill] sm:$0xff] %v4077_v15  ;;  %v4086_v23 = vrot.slane %v44_v54, %v4664_v11  ;;  %v122_v54 = vld [vmem:[#allocation2 + $0x1d0] sm:$0xff] }
 0x1a1   :  { %v910_v30 = vpop.f32.mrb[27].mxu0  ;;  %4715 = vst [vmem:[#allocation8_spill] sm:$0xff] %v4082_v17 }
 0x1a2   :  { %4716 = vst [vmem:[#allocation9_spill] sm:$0xff] %v4086_v23 }
 0x1a5   :  { %v1054_v31 = vpop.f32.mrb[28].mxu1 }
 0x1a6   :  { %v1062_v32 = vadd.f32 %v1054_v31, %v954_v16  ;;  %v1013_v33 = vpop.f32.mrb[28].mxu0  ;;  %v3292_v34 = vpop.f32.mrb[29].mxu1 }
 0x1a7   :  { %v1060_v35 = vadd.f32 %v1013_v33, %v952_v20  ;;  %v1015_v37 = vpop.f32.mrb[29].mxu0  ;;  %v1057_v38 = vpop.f32.mrb[30].mxu1  ;;  %v89_v33 = vld [vmem:[#allocation2 + $0xc8] sm:$0xff]  ;;  %v120_v34 = vld [vmem:[#allocation2 + $0x1c0] sm:$0xff] }
 0x1a8   :  { %v1061_v39 = vadd.f32 %v1015_v37, %v953_v26  ;;  %v1017_v40 = vpop.f32.mrb[30].mxu0  ;;  %v3293_v41 = vpop.f32.mrb[31].mxu1  ;;  %v121_v37 = vld [vmem:[#allocation2 + $0x1c8] sm:$0xff]  ;;  %v72_v38 = vld [vmem:[#allocation2 + $0x40] sm:$0xff] }
 0x1a9   :  { %v1018_v42 = vpop.f32.mrb[31].mxu0  ;;  %v4093_v40 = vpack.c.bf16 %v121_v37, %v120_v34  ;;  %v94_v34 = vld [vmem:[#allocation2 + $0xf0] sm:$0xff]  ;;  %v95_v37 = vld [vmem:[#allocation2 + $0xf8] sm:$0xff] }
 0x1aa   :  { %v104_v42 = vld [vmem:[#allocation2 + $0x140] sm:$0xff] }
 0x1ab   :  { %4718 = vst [vmem:[#allocation11_spill] sm:$0xff] %v4093_v40  ;;  %3403 = vmatprep.subr.bf16.mxu1 %v4093_v40  ;;  %v147_v40 = vld [vmem:[#allocation2 + $0x298] sm:$0xff] }
 0x1ad   :  { %v1162_v45 = vpop.f32.mrb[32].mxu1 }
 0x1ae   :  { %v1170_v48 = vadd.f32 %v1162_v45, %v1062_v32  ;;  %v1121_v49 = vpop.f32.mrb[32].mxu0  ;;  %v3298_v50 = vpop.f32.mrb[33].mxu1  ;;  %v88_v32 = vld [vmem:[#allocation2 + $0xc0] sm:$0xff]  ;;  %v105_v45 = vld [vmem:[#allocation2 + $0x148] sm:$0xff] }
 0x1af   :  { %v1168_v57 = vadd.f32 %v1121_v49, %v1060_v35  ;;  %v1123_v58 = vpop.f32.mrb[33].mxu0  ;;  %v1165_v61 = vpop.f32.mrb[34].mxu1  ;;  %v4091_v35 = vpack.c.bf16 %v89_v33, %v88_v32  ;;  %v4098_v49 = vpack.c.bf16 %v105_v45, %v104_v42  ;;  %v91_v50 = vld [vmem:[#allocation2 + $0xd8] sm:$0xff]  ;;  %v109_v32 = vld [vmem:[#allocation2 + $0x168] sm:$0xff]  ;;  %v4126_v42 = vpack.c.bf16 %v95_v37, %v94_v34 }
 0x1b0   :  { %v1169_v63 = vadd.f32 %v1123_v58, %v1061_v39  ;;  %v1125_v0 = vpop.f32.mrb[34].mxu0  ;;  %v3299_v2 = vpop.f32.mrb[35].mxu1  ;;  %v1178_v9 = vadd.f32 %v4065_v46, %v1170_v48  ;;  %v73_v39 = vld [vmem:[#allocation2 + $0x48] sm:$0xff]  ;;  %v90_v48 = vld [vmem:[#allocation2 + $0xd0] sm:$0xff]  ;;  %v127_v45 = vld [vmem:[#allocation2 + $0x1f8] sm:$0xff] }
 0x1b1   :  { %v1126_v12 = vpop.f32.mrb[35].mxu0  ;;  %v1176_v13 = vadd.f32 %v4065_v46, %v1168_v57  ;;  %4717 = vst [vmem:[#allocation10_spill] sm:$0xff] %v4091_v35  ;;  %v4095_v41 = vpack.c.bf16 %v73_v39, %v72_v38  ;;  %3371 = vmatprep.subr.bf16.mxu0 %v4091_v35  ;;  %4720 = vst [vmem:[#allocation13_spill] sm:$0xff] %v4098_v49  ;;  %v123_v57 = vld [vmem:[#allocation2 + $0x1d8] sm:$0xff]  ;;  %v4102_v58 = vpack.c.bf16 %v91_v50, %v90_v48  ;;  %v106_v2 = vld [vmem:[#allocation2 + $0x150] sm:$0xff] }
 0x1b2   :  { %v1177_v16 = vadd.f32 %v4065_v46, %v1169_v63  ;;  %v1181_v21 = vmax.f32 %v1178_v9, 0.0  ;;  %v4104_v61 = vpack.c.bf16 %v123_v57, %v122_v54  ;;  %v74_v63 = vld [vmem:[#allocation2 + $0x50] sm:$0xff]  ;;  %v75_v0 = vld [vmem:[#allocation2 + $0x58] sm:$0xff]  ;;  %3405 = vmatpush3.bf16.msra.mxu1 %v4098_v49  ;;  %4729 = vst [vmem:[#allocation22_spill] sm:$0xff] %v4126_v42  ;;  %v56_v34 = vld [vmem:[%s4655_s4 + $0x8] sm:$0xff] }
 0x1b3   :  { %v1179_v18 = vmax.f32 %v1176_v13, 0.0  ;;  %4719 = vst [vmem:[#allocation12_spill] sm:$0xff] %v4095_v41  ;;  %3373 = vmatpush3.bf16.msra.mxu0 %v4095_v41  ;;  %4721 = vst [vmem:[#allocation14_spill] sm:$0xff] %v4102_v58  ;;  %v4107_v9 = vpack.c.bf16 %v75_v0, %v74_v63  ;;  %v107_v12 = vld [vmem:[#allocation2 + $0x158] sm:$0xff]  ;;  %v92_v13 = vld [vmem:[#allocation2 + $0xe0] sm:$0xff] }
 0x1b4   :  { %v1180_v20 = vmax.f32 %v1177_v16, 0.0  ;;  %v1200_v29 = vmul.f32 %v4086_v23, %v1181_v21  ;;  %4722 = vst [vmem:[#allocation15_spill] sm:$0xff] %v4104_v61  ;;  %v93_v16 = vld [vmem:[#allocation2 + $0xe8] sm:$0xff]  ;;  %3375 = vmatprep.subr.bf16.mxu0 %v4102_v58  ;;  %v124_v21 = vld [vmem:[#allocation2 + $0x1e0] sm:$0xff]  ;;  %3407 = vmatprep.subr.bf16.mxu1 %v4104_v61  ;;  %v126_v38 = vld [vmem:[#allocation2 + $0x1f0] sm:$0xff]  ;;  %v1276_v23 = vsub.s32 3, %v3741_v3 }
 0x1b5   :  { %v1198_v26 = vmul.f32 %v4077_v15, %v1179_v18  ;;  %4723 = vst [vmem:[#allocation16_spill] sm:$0xff] %v4107_v9  ;;  %v4112_v18 = vpack.c.bf16 %v107_v12, %v106_v2  ;;  %v78_v48 = vld [vmem:[#allocation2 + $0x70] sm:$0xff]  ;;  %v79_v50 = vld [vmem:[#allocation2 + $0x78] sm:$0xff]  ;;  %v4131_v54 = vpack.c.bf16 %v127_v45, %v126_v38  ;;  %v144_v12 = vld [vmem:[#allocation2 + $0x280] sm:$0xff] }
 0x1b6   :  { %v1199_v27 = vmul.f32 %v4082_v17, %v1180_v20  ;;  %v4114_v20 = vpack.c.bf16 %v93_v16, %v92_v13  ;;  %v110_v57 = vld [vmem:[#allocation2 + $0x170] sm:$0xff]  ;;  %v111_v63 = vld [vmem:[#allocation2 + $0x178] sm:$0xff]  ;;  %v4134_v0 = vpack.c.bf16 %v79_v50, %v78_v48  ;;  %v145_v13 = vld [vmem:[#allocation2 + $0x288] sm:$0xff] }
 0x1b7   :  { %4724 = vst [vmem:[#allocation17_spill] sm:$0xff] %v4112_v18  ;;  %3377 = vmatpush3.bf16.msra.mxu0 %v4107_v9  ;;  %3409 = vmatpush3.bf16.msra.mxu1 %v4112_v18  ;;  %4730 = vst [vmem:[#allocation23_spill] sm:$0xff] %v4131_v54  ;;  %v4138_v2 = vpack.c.bf16 %v111_v63, %v110_v57  ;;  %v176_v16 = vld [vmem:[#allocation2 + $0x380] sm:$0xff]  ;;  %v58_v37 = vld [vmem:[%s4655_s4 + $0x18] sm:$0xff] }
 0x1b8   :  { %v1201_v30 = vadd.f32 %v1199_v27, %v1198_v26  ;;  %4725 = vst [vmem:[#allocation18_spill] sm:$0xff] %v4114_v20  ;;  %v125_v26 = vld [vmem:[#allocation2 + $0x1e8] sm:$0xff]  ;;  %v76_v27 = vld [vmem:[#allocation2 + $0x60] sm:$0xff]  ;;  %3379 = vmatprep.subr.bf16.mxu0 %v4114_v20  ;;  %4731 = vst [vmem:[#allocation24_spill] sm:$0xff] %v4134_v0 }
 0x1b9   :  { %4732 = vst [vmem:[#allocation25_spill] sm:$0xff] %v4138_v2  ;;  %v55_v38 = vld [vmem:[%s4655_s4] sm:$0xff]  ;;  %v60_v45 = vld [vmem:[%s4655_s4 + $0x28] sm:$0xff]  ;;  %v62_v48 = vld [vmem:[%s4655_s4 + $0x38] sm:$0xff] }
 0x1ba   :  { %v1202_v31 = vadd.f32 %v1201_v30, %v1200_v29  ;;  %v4117_v29 = vpack.c.bf16 %v125_v26, %v124_v21  ;;  %v77_v30 = vld [vmem:[#allocation2 + $0x68] sm:$0xff]  ;;  %v4145_v21 = vpack.c.bf16 %v145_v13, %v144_v12  ;;  %v179_v35 = vld [vmem:[#allocation2 + $0x398] sm:$0xff] }
 0x1bb   :  { %v4120_v33 = vpack.c.bf16 %v77_v30, %v76_v27  ;;  %v177_v26 = vld [vmem:[#allocation2 + $0x388] sm:$0xff]  ;;  %v4167_v30 = vpop.permute.xlu0 %1613 }
 0x1bc   :  { %1203 = vadd.xlane.f32.xlu1 %v1202_v31  ;;  %4726 = vst [vmem:[#allocation19_spill] sm:$0xff] %v4117_v29  ;;  %v108_v31 = vld [vmem:[#allocation2 + $0x160] sm:$0xff]  ;;  %3411 = vmatprep.subr.bf16.mxu1 %v4117_v29  ;;  %4733 = vst [vmem:[#allocation26_spill] sm:$0xff] %v4145_v21  ;;  %v4149_v27 = vpack.c.bf16 %v177_v26, %v176_v16 }
 0x1bd   :  { %4727 = vst [vmem:[#allocation20_spill] sm:$0xff] %v4120_v33  ;;  %v4124_v39 = vpack.c.bf16 %v109_v32, %v108_v31  ;;  %3381 = vmatpush3.bf16.msra.mxu0 %v4120_v33  ;;  %v4735_v33 = vsub.s32 1, %v3741_v3 }
 0x1be   :  { %3383 = vmatprep.subr.bf16.mxu0 %v4126_v42  ;;  %4734 = vst [vmem:[#allocation27_spill] sm:$0xff] %v4149_v27 }
 0x1bf   :  { %4728 = vst [vmem:[#allocation21_spill] sm:$0xff] %v4124_v39  ;;  %3413 = vmatpush3.bf16.msra.mxu1 %v4124_v39  ;;  %v4169_v31 = vpop.permute.xlu0 %1615 }
 0x1c0   :  { %3415 = vmatprep.subr.bf16.mxu1 %v4131_v54 }
 0x1c1   :  { %3385 = vmatpush3.bf16.msra.mxu0 %v4134_v0 }
 0x1c2   :  { %3419 = vmatprep.subr.bf16.mxu0 %v4145_v21  ;;  %v1292_v21 = vsub.s32 7, %v3741_v3 }
 0x1c3   :  { %3417 = vmatpush3.bf16.msra.mxu1 %v4138_v2  ;;  %v4171_v32 = vpop.permute.xlu0 %1611 }
 0x1c4   :  { %3451 = vmatprep.subr.bf16.mxu1 %v4149_v27 }
 0x1c7   :  { %v4197_v16 = vpop.permute.xlu0 %1617 }
 0x1cb   :  { %v4209_v39 = vpop.permute.xlu0 %1804 }
 0x1cd   :  { %1908 = vrot.lane.b32.xlu1 %v3966_v53, %s3677_s22 }
 0x1d1   :  { %2014 = vrot.lane.b32.xlu1 %v3971_v55, %s3678_s23 }
 0x1d5   :  { %2016 = vrot.lane.b32.xlu1 %v3979_v56, %s3678_s23 }
 0x1d9   :  { %2118 = vrot.lane.b32.xlu1 %v3971_v55, %s3679_s24 }
 0x1dd   :  { %2120 = vrot.lane.b32.xlu1 %v3979_v56, %s3679_s24 }
 0x1e1   :  { %2222 = vrot.lane.b32.xlu1 %v3971_v55, %s3680_s25 }
 0x1e5   :  { %2224 = vrot.lane.b32.xlu1 %v3979_v56, %s3680_s25 }
 0x1e9   :  { %2326 = vrot.lane.b32.xlu1 %v3971_v55, %s3681_s26 }
 0x1ed   :  { %2328 = vrot.lane.b32.xlu1 %v3979_v56, %s3681_s26 }
 0x1f1   :  { %2430 = vrot.lane.b32.xlu1 %v3971_v55, %s3682_s27 }
 0x1f5   :  { %2432 = vrot.lane.b32.xlu1 %v3979_v56, %s3682_s27  ;;  %v57_v56 = vld [vmem:[%s4655_s4 + $0x10] sm:$0xff] }
 0x249   :  { %v4191_v50 = vpop.xlane.xlu1 %1203 }
 0x24a   :  { %v1206_v57 = vmul.f32 %v4191_v50, %v56_v34  ;;  %v1208_v63 = vmul.f32 %v4191_v50, %v58_v37  ;;  %v1205_v12 = vmul.f32 %v4191_v50, %v55_v38  ;;  %v1207_v13 = vmul.f32 %v4191_v50, %v57_v56  ;;  %v4205_v37 = vld [vmem:[%s4656_s5] sm:$0xff] }
 0x24b   :  { %v1210_v26 = vmul.f32 %v4191_v50, %v60_v45  ;;  %v1212_v10 = vmul.f32 %v4191_v50, %v62_v48  ;;  %v1284_v48 = vsub.s32 5, %v3741_v3  ;;  %v4214_v29 = vrot.slane %v4205_v37, %v4735_v33  ;;  %v128_v33 = vld [vmem:[#allocation2 + $0x200] sm:$0xff] }
 0x24c   :  { %v1219_v5 = vrot.slane %v1206_v57, 4  ;;  %v1231_v11 = vrot.slane %v1208_v63, 4  ;;  %v1213_v47 = vrot.slane %v1205_v12, 4  ;;  %v1225_v6 = vrot.slane %v1207_v13, 4 }
 0x24d   :  { %v1243_v17 = vrot.slane %v1210_v26, 4  ;;  %v1255_v34 = vrot.slane %v1212_v10, 4 }
 0x24e   :  { %v1220_v38 = vadd.f32 %v1219_v5, %v1206_v57  ;;  %v1232_v56 = vadd.f32 %v1231_v11, %v1208_v63  ;;  %v1214_v15 = vadd.f32 %v1213_v47, %v1205_v12  ;;  %v1226_v46 = vadd.f32 %v1225_v6, %v1207_v13 }
 0x24f   :  { %v1244_v45 = vadd.f32 %v1243_v17, %v1210_v26  ;;  %v1256_v27 = vadd.f32 %v1255_v34, %v1212_v10  ;;  %v4217_v5 = vrot.slane %v4205_v37, %v1276_v23  ;;  %v4736_v63 = vsub.s32 0, %v3741_v3  ;;  %v129_v34 = vld [vmem:[#allocation2 + $0x208] sm:$0xff] }
 0x250   :  { %v1221_v2 = vrot.slane %v1220_v38, 2  ;;  %v1233_v0 = vrot.slane %v1232_v56, 2  ;;  %v1215_v54 = vrot.slane %v1214_v15, 2  ;;  %v1227_v42 = vrot.slane %v1226_v46, 2 }
 0x251   :  { %v1245_v47 = vrot.slane %v1244_v45, 2  ;;  %v1257_v6 = vrot.slane %v1256_v27, 2  ;;  %v4222_v12 = vrot.slane %v4205_v37, %v4736_v63  ;;  %v4737_v13 = vsub.s32 2, %v3741_v3 }
 0x252   :  { %v1222_v11 = vadd.f32 %v1221_v2, %v1220_v38  ;;  %v1234_v10 = vadd.f32 %v1233_v0, %v1232_v56  ;;  %v1216_v17 = vadd.f32 %v1215_v54, %v1214_v15  ;;  %v1228_v57 = vadd.f32 %v1227_v42, %v1226_v46  ;;  %v160_v15 = vld [vmem:[#allocation2 + $0x300] sm:$0xff]  ;;  %v161_v46 = vld [vmem:[#allocation2 + $0x308] sm:$0xff] }
 0x253   :  { %v4227_v26 = vrot.slane %v4205_v37, %v4737_v13  ;;  %v1246_v23 = vadd.f32 %v1245_v47, %v1244_v45  ;;  %v1258_v20 = vadd.f32 %v1257_v6, %v1256_v27  ;;  %v4230_v54 = vrot.slane %v4205_v37, %v1284_v48  ;;  %v146_v45 = vld [vmem:[#allocation2 + $0x290] sm:$0xff]  ;;  %v4235_v27 = vpop.permute.xlu0 %1806 }
 0x254   :  { %v1223_v18 = vrot.slane %v1222_v11, 1  ;;  %v1235_v9 = vrot.slane %v1234_v10, 1  ;;  %v1217_v2 = vrot.slane %v1216_v17, 1  ;;  %v1229_v0 = vrot.slane %v1228_v57, 1  ;;  %v178_v48 = vld [vmem:[#allocation2 + $0x390] sm:$0xff] }
 0x255   :  { %v1247_v42 = vrot.slane %v1246_v23, 1  ;;  %v1259_v38 = vrot.slane %v1258_v20, 1  ;;  %v4233_v56 = vrot.slane %v4205_v37, %v1292_v21  ;;  %v4237_v47 = vpack.c.bf16 %v129_v34, %v128_v33  ;;  %v148_v33 = vld [vmem:[#allocation2 + $0x2a0] sm:$0xff]  ;;  %v149_v34 = vld [vmem:[#allocation2 + $0x2a8] sm:$0xff] }
 0x256   :  { %v1224_v63 = vadd.f32 %v1223_v18, %v1222_v11  ;;  %v1236_v13 = vadd.f32 %v1235_v9, %v1234_v10  ;;  %v1218_v61 = vadd.f32 %v1217_v2, %v1216_v17  ;;  %v1230_v58 = vadd.f32 %v1229_v0, %v1228_v57  ;;  %v130_v11 = vld [vmem:[#allocation2 + $0x210] sm:$0xff]  ;;  %v131_v10 = vld [vmem:[#allocation2 + $0x218] sm:$0xff]  ;;  %v4248_v57 = vld [vmem:[%s4655_s4 + $0x20] sm:$0xff] }
 0x257   :  { %v4239_v6 = vpack.c.bf16 %v161_v46, %v160_v15  ;;  %v1248_v49 = vadd.f32 %v1247_v42, %v1246_v23  ;;  %v1260_v41 = vadd.f32 %v1259_v38, %v1258_v20  ;;  %v162_v17 = vld [vmem:[#allocation2 + $0x310] sm:$0xff]  ;;  %4738 = vst [vmem:[#allocation28_spill] sm:$0xff] %v4248_v57  ;;  %v163_v20 = vld [vmem:[#allocation2 + $0x318] sm:$0xff]  ;;  %v4250_v23 = vpack.c.bf16 %v147_v40, %v146_v45  ;;  %v181_v0 = vld [vmem:[#allocation2 + $0x3a8] sm:$0xff] }
 0x258   :  { %v1303_v4 = vadd.f32 %v4214_v29, %v1224_v63  ;;  %v1305_v21 = vadd.f32 %v4217_v5, %v1236_v13  ;;  %v1302_v9 = vadd.f32 %v4222_v12, %v1218_v61  ;;  %v1304_v18 = vadd.f32 %v4227_v26, %v1230_v58  ;;  %v180_v61 = vld [vmem:[#allocation2 + $0x3a0] sm:$0xff]  ;;  %v4257_v58 = vld [vmem:[%s4655_s4 + $0x30] sm:$0xff]  ;;  %v133_v38 = vld [vmem:[#allocation2 + $0x228] sm:$0xff]  ;;  %v4269_v63 = vpop.permute.xlu0 %1802 }
 0x259   :  { %4739 = vst [vmem:[#allocation29_spill] sm:$0xff] %v4250_v23  ;;  %v4252_v2 = vpack.c.bf16 %v179_v35, %v178_v48  ;;  %4741 = vst [vmem:[#allocation31_spill] sm:$0xff] %v4257_v58  ;;  %v1307_v15 = vadd.f32 %v4230_v54, %v1248_v49  ;;  %v1309_v46 = vadd.f32 %v4233_v56, %v1260_v41  ;;  %v132_v42 = vld [vmem:[#allocation2 + $0x220] sm:$0xff]  ;;  %v165_v41 = vld [vmem:[#allocation2 + $0x328] sm:$0xff] }
 0x25a   :  { %1374 = vmatprep.mubr.f32.mxu0 %v1303_v4  ;;  %1444 = vmatprep.mubr.f32.mxu1 %v1305_v21  ;;  %v4263_v4 = vpack.c.bf16 %v131_v10, %v130_v11  ;;  %v4265_v35 = vpack.c.bf16 %v163_v20, %v162_v17  ;;  %v4267_v40 = vpack.c.bf16 %v149_v34, %v148_v33  ;;  %v164_v49 = vld [vmem:[#allocation2 + $0x320] sm:$0xff]  ;;  %v150_v45 = vld [vmem:[#allocation2 + $0x2b0] sm:$0xff]  ;;  %v183_v11 = vld [vmem:[#allocation2 + $0x3b8] sm:$0xff] }
 0x25b   :  { %4740 = vst [vmem:[#allocation30_spill] sm:$0xff] %v4252_v2  ;;  %1375 = vmatmul.mubr.f32.vlgmr.msra.gmra.mrb[36].mxu0 %v1302_v9  ;;  %1445 = vmatmul.mubr.f32.vlgmr.msra.gmra.mrb[36].mxu1 %v1304_v18  ;;  %v4271_v13 = vpack.c.bf16 %v181_v0, %v180_v61  ;;  %v1209_v48 = vmul.f32 %v4191_v50, %v4248_v57  ;;  %v151_v9 = vld [vmem:[#allocation2 + $0x2b8] sm:$0xff]  ;;  %v182_v18 = vld [vmem:[#allocation2 + $0x3b0] sm:$0xff] }
 0x25c   :  { %3421 = vmatpush3.bf16.msra.mxu0 %v4237_v47  ;;  %3453 = vmatpush3.bf16.msra.mxu1 %v4239_v6  ;;  %4742 = vst [vmem:[#allocation32_spill] sm:$0xff] %v4263_v4  ;;  %4743 = vst [vmem:[#allocation33_spill] sm:$0xff] %v4265_v35  ;;  %v1211_v21 = vmul.f32 %v4191_v50, %v4257_v58  ;;  %v4281_v10 = vpack.c.bf16 %v133_v38, %v132_v42  ;;  %v134_v20 = vld [vmem:[#allocation2 + $0x230] sm:$0xff]  ;;  %v135_v33 = vld [vmem:[#allocation2 + $0x238] sm:$0xff] }
 0x25d   :  { %4744 = vst [vmem:[#allocation34_spill] sm:$0xff] %v4267_v40  ;;  %1514 = vmatprep.mubr.f32.mxu0 %v1307_v15  ;;  %1584 = vmatprep.mubr.f32.mxu1 %v1309_v46  ;;  %4745 = vst [vmem:[#allocation35_spill] sm:$0xff] %v4271_v13  ;;  %v4283_v17 = vpack.c.bf16 %v165_v41, %v164_v49  ;;  %v166_v34 = vld [vmem:[#allocation2 + $0x330] sm:$0xff]  ;;  %v4287_v50 = vpack.c.bf16 %v151_v9, %v150_v45  ;;  %v167_v0 = vld [vmem:[#allocation2 + $0x338] sm:$0xff]  ;;  %v4291_v49 = vpop.permute.xlu0 %1808 }
 0x25e   :  { %3423 = vmatprep.subr.bf16.mxu0 %v4250_v23  ;;  %3455 = vmatprep.subr.bf16.mxu1 %v4252_v2  ;;  %4746 = vst [vmem:[#allocation36_spill] sm:$0xff] %v4281_v10  ;;  %v4289_v61 = vpack.c.bf16 %v183_v11, %v182_v18  ;;  %v152_v15 = vld [vmem:[#allocation2 + $0x2c0] sm:$0xff]  ;;  %v153_v46 = vld [vmem:[#allocation2 + $0x2c8] sm:$0xff]  ;;  %v4295_v41 = vpack.c.bf16 %v135_v33, %v134_v20  ;;  %v154_v23 = vld [vmem:[#allocation2 + $0x2d0] sm:$0xff] }
 0x25f   :  { %4747 = vst [vmem:[#allocation37_spill] sm:$0xff] %v4283_v17  ;;  %4748 = vst [vmem:[#allocation38_spill] sm:$0xff] %v4287_v50  ;;  %v184_v42 = vld [vmem:[#allocation2 + $0x3c0] sm:$0xff]  ;;  %v185_v38 = vld [vmem:[#allocation2 + $0x3c8] sm:$0xff]  ;;  %v4299_v45 = vpack.c.bf16 %v153_v46, %v152_v15 }
 0x260   :  { %3425 = vmatpush3.bf16.msra.mxu0 %v4263_v4  ;;  %3457 = vmatpush3.bf16.msra.mxu1 %v4265_v35  ;;  %4749 = vst [vmem:[#allocation39_spill] sm:$0xff] %v4289_v61  ;;  %v1237_v4 = vrot.slane %v1209_v48, 4  ;;  %v1249_v35 = vrot.slane %v1211_v21, 4  ;;  %4750 = vst [vmem:[#allocation40_spill] sm:$0xff] %v4295_v41  ;;  %v136_v9 = vld [vmem:[#allocation2 + $0x240] sm:$0xff]  ;;  %v137_v18 = vld [vmem:[#allocation2 + $0x248] sm:$0xff]  ;;  %v4303_v11 = vpack.c.bf16 %v185_v38, %v184_v42 }
 0x261   :  { %3427 = vmatprep.subr.bf16.mxu0 %v4267_v40  ;;  %3459 = vmatprep.subr.bf16.mxu1 %v4271_v13  ;;  %v4297_v13 = vpack.c.bf16 %v167_v0, %v166_v34  ;;  %4752 = vst [vmem:[#allocation42_spill] sm:$0xff] %v4299_v45  ;;  %v168_v40 = vld [vmem:[#allocation2 + $0x340] sm:$0xff]  ;;  %v169_v2 = vld [vmem:[#allocation2 + $0x348] sm:$0xff]  ;;  %v186_v20 = vld [vmem:[#allocation2 + $0x3d0] sm:$0xff]  ;;  %v4307_v34 = vpack.c.bf16 %v137_v18, %v136_v9  ;;  %v4311_v38 = vpop.permute.xlu0 %1910 }
 0x262   :  { %4753 = vst [vmem:[#allocation43_spill] sm:$0xff] %v4303_v11  ;;  %v1250_v58 = vadd.f32 %v1249_v35, %v1211_v21  ;;  %v187_v33 = vld [vmem:[#allocation2 + $0x3d8] sm:$0xff]  ;;  %v4309_v0 = vpack.c.bf16 %v169_v2, %v168_v40  ;;  %v138_v15 = vld [vmem:[#allocation2 + $0x250] sm:$0xff]  ;;  %v156_v21 = vld [vmem:[#allocation2 + $0x2e0] sm:$0xff] }
 0x263   :  { %4751 = vst [vmem:[#allocation41_spill] sm:$0xff] %v4297_v13  ;;  %4754 = vst [vmem:[#allocation44_spill] sm:$0xff] %v4307_v34  ;;  %v139_v46 = vld [vmem:[#allocation2 + $0x258] sm:$0xff]  ;;  %v170_v42 = vld [vmem:[#allocation2 + $0x350] sm:$0xff]  ;;  %v4317_v35 = vpack.c.bf16 %v187_v33, %v186_v20 }
 0x264   :  { %3429 = vmatpush3.bf16.msra.mxu0 %v4281_v10  ;;  %3461 = vmatpush3.bf16.msra.mxu1 %v4283_v17  ;;  %v1238_v10 = vadd.f32 %v1237_v4, %v1209_v48  ;;  %v155_v17 = vld [vmem:[#allocation2 + $0x2d8] sm:$0xff]  ;;  %4755 = vst [vmem:[#allocation45_spill] sm:$0xff] %v4309_v0  ;;  %v1251_v18 = vrot.slane %v1250_v58, 2  ;;  %v188_v2 = vld [vmem:[#allocation2 + $0x3e0] sm:$0xff]  ;;  %v189_v40 = vld [vmem:[#allocation2 + $0x3e8] sm:$0xff] }
 0x265   :  { %3431 = vmatprep.subr.bf16.mxu0 %v4287_v50  ;;  %3463 = vmatprep.subr.bf16.mxu1 %v4289_v61  ;;  %v4315_v4 = vpack.c.bf16 %v155_v17, %v154_v23  ;;  %4756 = vst [vmem:[#allocation46_spill] sm:$0xff] %v4317_v35  ;;  %v171_v48 = vld [vmem:[#allocation2 + $0x358] sm:$0xff]  ;;  %v140_v23 = vld [vmem:[#allocation2 + $0x260] sm:$0xff]  ;;  %v141_v17 = vld [vmem:[#allocation2 + $0x268] sm:$0xff]  ;;  %v4329_v20 = vpack.c.bf16 %v189_v40, %v188_v2  ;;  %v1288_v40 = vsub.s32 6, %v3741_v3 }
 0x266   :  { %v1239_v9 = vrot.slane %v1238_v10, 2  ;;  %v172_v33 = vld [vmem:[#allocation2 + $0x360] sm:$0xff]  ;;  %v173_v61 = vld [vmem:[#allocation2 + $0x368] sm:$0xff]  ;;  %v158_v50 = vld [vmem:[#allocation2 + $0x2f0] sm:$0xff]  ;;  %v1252_v57 = vadd.f32 %v1251_v18, %v1250_v58 }
 0x267   :  { %v142_v2 = vld [vmem:[#allocation2 + $0x270] sm:$0xff] }
 0x268   :  { %3433 = vmatpush3.bf16.msra.mxu0 %v4295_v41  ;;  %3465 = vmatpush3.bf16.msra.mxu1 %v4297_v13  ;;  %v157_v13 = vld [vmem:[#allocation2 + $0x2e8] sm:$0xff]  ;;  %v4321_v41 = vpack.c.bf16 %v139_v46, %v138_v15  ;;  %v190_v15 = vld [vmem:[#allocation2 + $0x3f0] sm:$0xff]  ;;  %v191_v46 = vld [vmem:[#allocation2 + $0x3f8] sm:$0xff] }
 0x269   :  { %3435 = vmatprep.subr.bf16.mxu0 %v4299_v45  ;;  %3467 = vmatprep.subr.bf16.mxu1 %v4303_v11  ;;  %v4323_v45 = vpack.c.bf16 %v171_v48, %v170_v42  ;;  %v4325_v11 = vpack.c.bf16 %v157_v13, %v156_v21  ;;  %v4331_v42 = vpop.permute.xlu0 %1906  ;;  %v1280_v13 = vsub.s32 4, %v3741_v3  ;;  %v4336_v48 = vpack.c.bf16 %v141_v17, %v140_v23  ;;  %v174_v18 = vld [vmem:[#allocation2 + $0x370] sm:$0xff] }
 0x26a   :  { %4757 = vst [vmem:[#allocation47_spill] sm:$0xff] %v4321_v41  ;;  %v4338_v21 = vpack.c.bf16 %v173_v61, %v172_v33  ;;  %v4350_v61 = vpop.permute.xlu1 %1908  ;;  %v1620_v3 = vsel %vm220_vm2, %v4167_v30, %v4169_v31 }
 0x26b   :  { %4758 = vst [vmem:[#allocation48_spill] sm:$0xff] %v4323_v45  ;;  %v4348_v23 = vrot.slane %v4205_v37, %v1280_v13  ;;  %v1626_v13 = vand.u32 %v1620_v3, %v3826_v22 }
 0x26c   :  { %3437 = vmatpush3.bf16.msra.mxu0 %v4307_v34  ;;  %3469 = vmatpush3.bf16.msra.mxu1 %v4309_v0  ;;  %v1240_v34 = vadd.f32 %v1239_v9, %v1238_v10  ;;  %v159_v0 = vld [vmem:[#allocation2 + $0x2f8] sm:$0xff]  ;;  %v4345_v10 = vpack.c.bf16 %v191_v46, %v190_v15  ;;  %v4366_v46 = vrot.slane %v4205_v37, %v1288_v40 }
 0x26d   :  { %3439 = vmatprep.subr.bf16.mxu0 %v4315_v4  ;;  %3471 = vmatprep.subr.bf16.mxu1 %v4317_v35  ;;  %v4343_v58 = vpack.c.bf16 %v159_v0, %v158_v50  ;;  %v143_v9 = vld [vmem:[#allocation2 + $0x278] sm:$0xff]  ;;  %v4361_v17 = vpop.permute.xlu0 %1912  ;;  %v1719_v40 = vand.u32 %v3971_v55, %v3826_v22  ;;  %v1810_v55 = vsel %vm423_vm4, %v4269_v63, %v4209_v39 }
 0x26e   :  { %v1241_v35 = vrot.slane %v1240_v34, 1  ;;  %v4357_v50 = vpack.c.bf16 %v143_v9, %v142_v2  ;;  %v1619_v2 = vsel %vm220_vm2, %v4171_v32, %v4167_v30  ;;  %v4375_v9 = vpop.permute.xlu1 %2014 }
 0x26f   :  { %v1623_v30 = vand.u32 %v1619_v2, %v3826_v22 }
 0x270   :  { %3441 = vmatpush3.bf16.msra.mxu0 %v4321_v41  ;;  %3473 = vmatpush3.bf16.msra.mxu1 %v4323_v45  ;;  %v175_v41 = vld [vmem:[#allocation2 + $0x378] sm:$0xff]  ;;  %v1253_v45 = vrot.slane %v1252_v57, 1  ;;  %v1242_v33 = vadd.f32 %v1241_v35, %v1240_v34  ;;  %v4759_v34 = vmov 0.0   ;;  %v1713_v35 = vand.u32 %v3962_v52, %v3826_v22 }
 0x271   :  { %3443 = vmatprep.subr.bf16.mxu0 %v4325_v11  ;;  %3475 = vmatprep.subr.bf16.mxu1 %v4329_v20  ;;  %v4359_v0 = vpack.c.bf16 %v175_v41, %v174_v18  ;;  %v1621_v41 = vsel %vm220_vm2, %v4169_v31, %v4197_v16  ;;  %v1716_v31 = vand.u32 %v3966_v53, %v3826_v22  ;;  %v4760_v18 = vmov 0  }
 0x272   :  { %v1254_v15 = vadd.f32 %v1253_v45, %v1252_v57  ;;  %v4379_v57 = vpop.permute.xlu0 %2012  ;;  %v1306_v37 = vadd.f32 %v4348_v23, %v1242_v33  ;;  %v1629_v32 = vand.u32 %v1621_v41, %v3826_v22  ;;  %v1811_v16 = vsel %vm423_vm4, %v4209_v39, %v4235_v27  ;;  %v2017_v53 = vpop.permute.xlu1 %2016 }
 0x273   :  { %v1817_v33 = vand.u32 %v1811_v16, %v3826_v22  ;;  %v1915_v52 = vsel %vm531_vm6, %v4350_v61, %v4311_v38  ;;  %v1914_v39 = vsel %vm531_vm6, %v4331_v42, %v4350_v61  ;;  %v2019_v63 = vsel %vm639_vm7, %v4379_v57, %v4375_v9 }
 0x274   :  { %3445 = vmatpush3.bf16.msra.mxu0 %v4336_v48  ;;  %3477 = vmatpush3.bf16.msra.mxu1 %v4338_v21  ;;  %v1308_v45 = vadd.f32 %v4366_v46, %v1254_v15  ;;  %v3629_v15 = vld [vmem:[%s4653_s2 + $0x4] sm:$0xf]  ;;  %v1918_v42 = vand.u32 %v1914_v39, %v3826_v22  ;;  %v2025_v61 = vand.u32 %v2019_v63, %v3826_v22 }
 0x275   :  { %3447 = vmatprep.subr.bf16.mxu0 %v4343_v58  ;;  %3479 = vmatprep.subr.bf16.mxu1 %v4345_v10 }
 0x276   :  { %v2011_v3 = vpop.permute.xlu0 %2010  ;;  %v2119_v2 = vpop.permute.xlu1 %2118 }
 0x278   :  { %3449 = vmatpush3.bf16.msra.mxu0 %v4357_v50  ;;  %3481 = vmatpush3.bf16.msra.mxu1 %v4359_v0 }
 0x279   :  { %1631 = vmatprep.subr.bf16.mxu0 %v1626_v13  ;;  %3300 = vmatprep.subr.bf16.mxu1 %v4759_v34  ;;  %v1812_v13 = vsel %vm423_vm4, %v4235_v27, %v4291_v49 }
 0x27a   :  { %v2117_v41 = vpop.permute.xlu0 %2116  ;;  %v2121_v27 = vpop.permute.xlu1 %2120 }
 0x27b   :  { %1515 = vmatmul.mubr.f32.vlgmr.msra.gmra.mrb[38].mxu0 %v1306_v37  ;;  %1585 = vmatmul.mubr.f32.vlgmr.msra.gmra.mrb[38].mxu1 %v1308_v45  ;;  %v1921_v37 = vand.u32 %v1915_v52, %v3826_v22  ;;  %v1814_v45 = vand.u32 %v1810_v55, %v3826_v22 }
 0x27c   :  { %1632 = vmatpush1.bf16.msra.mxu0 %v1623_v30  ;;  %3301 = vmatpush3.bf16.msra.mxu1 %v1629_v32  ;;  %v1820_v30 = vand.u32 %v1812_v13, %v3826_v22  ;;  %v3630_v32 = vld [vmem:[%s4653_s2] sm:$0xf] }
 0x27d   :  { %1663 = vmatprep.mubr.bf16.mxu0 %v4760_v18  ;;  %3302 = vmatprep.mubr.msk.bf16.mxu1 %vm3673_vm0, %v4759_v34 }
 0x27e   :  { %1721 = vmatprep.subr.bf16.mxu0 %v1716_v31  ;;  %3306 = vmatprep.subr.bf16.mxu1 %v4759_v34  ;;  %v2115_v49 = vpop.permute.xlu0 %2114  ;;  %v1916_v31 = vsel %vm531_vm6, %v4311_v38, %v4361_v17  ;;  %v2018_v38 = vsel %vm639_vm7, %v2011_v3, %v4379_v57  ;;  %v2020_v17 = vsel %vm639_vm7, %v4375_v9, %v2017_v53  ;;  %v3632_v9 = vld [vmem:[%s4653_s2 + $0xc] sm:$0xf] }
 0x27f   :  { %2912 = vmatmul.mubr.msk.bf16.vlgmr.msra.gmra.mrb[40].mxu0 %vm224_vm5, %v3629_v15  ;;  %3303 = vmatmul.mubr.msk.bf16.vlgmr.msra.gmra.mrb[40].mxu1 %vm224_vm5, %v3629_v15  ;;  %v1924_v16 = vand.u32 %v1916_v31, %v3826_v22  ;;  %v2123_v15 = vsel %vm747_vm8, %v2117_v41, %v2119_v2  ;;  %v2022_v52 = vand.u32 %v2018_v38, %v3826_v22 }
 0x280   :  { %1722 = vmatpush1.bf16.msra.mxu0 %v1713_v35  ;;  %3307 = vmatpush3.bf16.msra.mxu1 %v1719_v40  ;;  %v3631_v35 = vld [vmem:[%s4653_s2 + $0x8] sm:$0xf]  ;;  %v2223_v40 = vpop.permute.xlu1 %2222  ;;  %v2028_v55 = vand.u32 %v2020_v17, %v3826_v22  ;;  %v2129_v13 = vand.u32 %v2123_v15, %v3826_v22  ;;  %v2122_v53 = vsel %vm747_vm8, %v2115_v49, %v2117_v41 }
 0x281   :  { %1822 = vmatprep.subr.bf16.mxu0 %v1817_v33  ;;  %1753 = vmatprep.mubr.bf16.mxu0 %v4760_v18 }
 0x282   :  { %3308 = vmatprep.mubr.msk.bf16.mxu1 %vm3673_vm0, %v4759_v34  ;;  %3312 = vmatprep.subr.bf16.mxu1 %v4759_v34  ;;  %v2221_v33 = vpop.permute.xlu0 %2220 }
 0x284   :  { %v2225_v57 = vpop.permute.xlu1 %2224 }
 0x285   :  { %v2228_v49 = vsel %vm855_vm9, %v2223_v40, %v2225_v57 }
 0x286   :  { %v2219_v3 = vpop.permute.xlu0 %2218 }
 0x287   :  { %2914 = vmatmul.mubr.msk.bf16.vlgmr.msra.gmra.mrb[44].mxu0 %vm224_vm5, %v3630_v32  ;;  %3309 = vmatmul.mubr.msk.bf16.vlgmr.msra.gmra.mrb[44].mxu1 %vm224_vm5, %v3630_v32  ;;  %v2126_v32 = vand.u32 %v2122_v53, %v3826_v22 }
 0x288   :  { %1823 = vmatpush1.bf16.msra.mxu0 %v1814_v45  ;;  %3313 = vmatpush3.bf16.msra.mxu1 %v1820_v30  ;;  %v2227_v45 = vsel %vm855_vm9, %v2221_v33, %v2223_v40  ;;  %v2327_v30 = vpop.permute.xlu1 %2326  ;;  %v3634_v40 = vld [vmem:[%s4653_s2 + $0x14] sm:$0xf] }
 0x289   :  { %1926 = vmatprep.subr.bf16.mxu0 %v1921_v37  ;;  %1854 = vmatprep.mubr.bf16.mxu0 %v4760_v18  ;;  %v2124_v37 = vsel %vm747_vm8, %v2119_v2, %v2121_v27  ;;  %v2233_v41 = vand.u32 %v2227_v45, %v3826_v22  ;;  %v3633_v2 = vld [vmem:[%s4653_s2 + $0x10] sm:$0xf]  ;;  %v2226_v27 = vsel %vm855_vm9, %v2219_v3, %v2221_v33 }
 0x28a   :  { %3314 = vmatprep.mubr.msk.bf16.mxu1 %vm3673_vm0, %v4759_v34  ;;  %3318 = vmatprep.subr.bf16.mxu1 %v4759_v34  ;;  %v2132_v39 = vand.u32 %v2124_v37, %v3826_v22  ;;  %v2325_v63 = vpop.permute.xlu0 %2324  ;;  %v3635_v37 = vld [vmem:[%s4653_s2 + $0x18] sm:$0xf] }
 0x28c   :  { %v2329_v31 = vpop.permute.xlu1 %2328 }
 0x28f   :  { %2916 = vmatmul.mubr.msk.bf16.vlgmr.msra.gmra.mrb[48].mxu0 %vm224_vm5, %v3631_v35  ;;  %3315 = vmatmul.mubr.msk.bf16.vlgmr.msra.gmra.mrb[48].mxu1 %vm224_vm5, %v3631_v35  ;;  %v2236_v35 = vand.u32 %v2228_v49, %v3826_v22 }
 0x290   :  { %1927 = vmatpush1.bf16.msra.mxu0 %v1918_v42  ;;  %3319 = vmatpush3.bf16.msra.mxu1 %v1924_v16  ;;  %v2331_v42 = vsel %vm963_vm10, %v2325_v63, %v2327_v30  ;;  %v2230_v16 = vand.u32 %v2226_v27, %v3826_v22  ;;  %v2431_v38 = vpop.permute.xlu1 %2430 }
 0x291   :  { %2030 = vmatprep.subr.bf16.mxu0 %v2025_v61  ;;  %1958 = vmatprep.mubr.bf16.mxu0 %v4760_v18  ;;  %v2323_v61 = vpop.permute.xlu0 %2322  ;;  %v2337_v33 = vand.u32 %v2331_v42, %v3826_v22 }
 0x292   :  { %3320 = vmatprep.mubr.msk.bf16.mxu1 %vm3673_vm0, %v4759_v34  ;;  %3324 = vmatprep.subr.bf16.mxu1 %v4759_v34  ;;  %v2330_v15 = vsel %vm963_vm10, %v2323_v61, %v2325_v63  ;;  %v3636_v63 = vld [vmem:[%s4653_s2 + $0x1c] sm:$0xf] }
 0x294   :  { %v2433_v53 = vpop.permute.xlu1 %2432 }
 0x295   :  { %v2429_v17 = vpop.permute.xlu0 %2428 }
 0x297   :  { %2918 = vmatmul.mubr.msk.bf16.vlgmr.msra.gmra.mrb[52].mxu0 %vm224_vm5, %v3632_v9  ;;  %3321 = vmatmul.mubr.msk.bf16.vlgmr.msra.gmra.mrb[52].mxu1 %vm224_vm5, %v3632_v9 }
 0x298   :  { %2031 = vmatpush1.bf16.msra.mxu0 %v2022_v52  ;;  %3325 = vmatpush3.bf16.msra.mxu1 %v2028_v55  ;;  %v2332_v52 = vsel %vm963_vm10, %v2327_v30, %v2329_v31  ;;  %v2435_v55 = vsel %vm1071_vm11, %v2429_v17, %v2431_v38  ;;  %v2436_v30 = vsel %vm1071_vm11, %v2431_v38, %v2433_v53  ;;  %v4567_v31 = vld [vmem:[%s4658_s7] sm:$0x1] }
 0x299   :  { %2134 = vmatprep.subr.bf16.mxu0 %v2129_v13  ;;  %2062 = vmatprep.mubr.bf16.mxu0 %v4760_v18  ;;  %v2334_v13 = vand.u32 %v2330_v15, %v3826_v22  ;;  %v2340_v57 = vand.u32 %v2332_v52, %v3826_v22  ;;  %v2441_v3 = vand.u32 %v2435_v55, %v3826_v22  ;;  %v2427_v9 = vpop.permute.xlu0 %2426 }
 0x29a   :  { %3326 = vmatprep.mubr.msk.bf16.mxu1 %vm3673_vm0, %v4759_v34  ;;  %3330 = vmatprep.subr.bf16.mxu1 %v4759_v34  ;;  %v2434_v45 = vsel %vm1071_vm11, %v2427_v9, %v2429_v17 }
 0x29f   :  { %2920 = vmatmul.mubr.msk.bf16.vlgmr.msra.gmra.mrb[56].mxu0 %vm224_vm5, %v3633_v2  ;;  %3327 = vmatmul.mubr.msk.bf16.vlgmr.msra.gmra.mrb[56].mxu1 %vm224_vm5, %v3633_v2  ;;  %v4779_v2 = vld [vmem:[#allocation27_spill] sm:$0xff] }
 0x2a0   :  { %2135 = vmatpush1.bf16.msra.mxu0 %v2126_v32  ;;  %3331 = vmatpush3.bf16.msra.mxu1 %v2132_v39  ;;  %v2438_v32 = vand.u32 %v2434_v45, %v3826_v22  ;;  %v2444_v39 = vand.u32 %v2436_v30, %v3826_v22  ;;  %v3637_v22 = vld [vmem:[%s4653_s2 + $0x20] sm:$0xf] }
 0x2a1   :  { %2238 = vmatprep.subr.bf16.mxu0 %v2233_v41  ;;  %2166 = vmatprep.mubr.bf16.mxu0 %v4760_v18  ;;  %v4778_v41 = vld [vmem:[#allocation26_spill] sm:$0xff] }
 0x2a2   :  { %3332 = vmatprep.mubr.msk.bf16.mxu1 %vm3673_vm0, %v4759_v34  ;;  %3336 = vmatprep.subr.bf16.mxu1 %v4759_v34 }
 0x2a7   :  { %2922 = vmatmul.mubr.msk.bf16.vlgmr.msra.gmra.mrb[60].mxu0 %vm224_vm5, %v3634_v40  ;;  %3333 = vmatmul.mubr.msk.bf16.vlgmr.msra.gmra.mrb[60].mxu1 %vm224_vm5, %v3634_v40 }
 0x2a8   :  { %2239 = vmatpush1.bf16.msra.mxu0 %v2230_v16  ;;  %3337 = vmatpush3.bf16.msra.mxu1 %v2236_v35 }
 0x2a9   :  { %2342 = vmatprep.subr.bf16.mxu0 %v2337_v33  ;;  %2270 = vmatprep.mubr.bf16.mxu0 %v4760_v18 }
 0x2aa   :  { %3338 = vmatprep.mubr.msk.bf16.mxu1 %vm3673_vm0, %v4759_v34  ;;  %3342 = vmatprep.subr.bf16.mxu1 %v4759_v34 }
 0x2af   :  { %2924 = vmatmul.mubr.msk.bf16.vlgmr.msra.gmra.mrb[64].mxu0 %vm224_vm5, %v3635_v37  ;;  %3339 = vmatmul.mubr.msk.bf16.vlgmr.msra.gmra.mrb[64].mxu1 %vm224_vm5, %v3635_v37 }
 0x2b0   :  { %2343 = vmatpush1.bf16.msra.mxu0 %v2334_v13  ;;  %3343 = vmatpush3.bf16.msra.mxu1 %v2340_v57 }
 0x2b1   :  { %2446 = vmatprep.subr.bf16.mxu0 %v2441_v3  ;;  %2374 = vmatprep.mubr.bf16.mxu0 %v4760_v18 }
 0x2b2   :  { %3344 = vmatprep.mubr.msk.bf16.mxu1 %vm3673_vm0, %v4759_v34  ;;  %3348 = vmatprep.subr.bf16.mxu1 %v4759_v34 }
 0x2b7   :  { %2926 = vmatmul.mubr.msk.bf16.vlgmr.msra.gmra.mrb[68].mxu0 %vm224_vm5, %v3636_v63  ;;  %3345 = vmatmul.mubr.msk.bf16.vlgmr.msra.gmra.mrb[68].mxu1 %vm224_vm5, %v3636_v63 }
 0x2b8   :  { %2447 = vmatpush1.bf16.msra.mxu0 %v2438_v32  ;;  %3349 = vmatpush3.bf16.msra.mxu1 %v2444_v39 }
 0x2b9   :  { %2478 = vmatprep.mubr.bf16.mxu0 %v4760_v18  ;;  %3350 = vmatprep.mubr.msk.bf16.mxu1 %vm3673_vm0, %v4759_v34  ;;  %v4776_v34 = vld [vmem:[#allocation24_spill] sm:$0xff]  ;;  %v4777_v18 = vld [vmem:[#allocation25_spill] sm:$0xff] }
 0x2ba   :  { %3483 = vmatprep.subr.bf16.mxu0 %v4001_v62  ;;  %3515 = vmatprep.subr.bf16.mxu1 %v4003_v7  ;;  %v4761_v62 = vld [vmem:[#allocation5_spill] sm:$0xff]  ;;  %v4762_v7 = vld [vmem:[#allocation10_spill] sm:$0xff] }
 0x2bf   :  { %2928 = vmatmul.mubr.msk.bf16.vlgmr.msra.gmra.mrb[72].mxu0 %vm224_vm5, %v3637_v22  ;;  %3351 = vmatmul.mubr.msk.bf16.vlgmr.msra.gmra.mrb[72].mxu1 %vm224_vm5, %v3637_v22 }
 0x2c0   :  { %3485 = vmatpush3.bf16.msra.mxu0 %v4005_v8  ;;  %3517 = vmatpush3.bf16.msra.mxu1 %v4008_v14  ;;  %v4763_v8 = vld [vmem:[#allocation11_spill] sm:$0xff]  ;;  %v4764_v14 = vld [vmem:[#allocation12_spill] sm:$0xff] }
 0x2c1   :  { %3487 = vmatprep.subr.bf16.mxu0 %v4015_v19  ;;  %3519 = vmatprep.subr.bf16.mxu1 %v4017_v24  ;;  %v4765_v19 = vld [vmem:[#allocation13_spill] sm:$0xff]  ;;  %v4766_v24 = vld [vmem:[#allocation14_spill] sm:$0xff] }
 0x2c4   :  { %3489 = vmatpush3.bf16.msra.mxu0 %v4019_v25  ;;  %3521 = vmatpush3.bf16.msra.mxu1 %v4022_v28  ;;  %v4767_v25 = vld [vmem:[#allocation15_spill] sm:$0xff]  ;;  %v4768_v28 = vld [vmem:[#allocation16_spill] sm:$0xff] }
 0x2c5   :  { %3491 = vmatprep.subr.bf16.mxu0 %v4029_v36  ;;  %3523 = vmatprep.subr.bf16.mxu1 %v4031_v43  ;;  %v4769_v36 = vld [vmem:[#allocation17_spill] sm:$0xff]  ;;  %v4770_v43 = vld [vmem:[#allocation18_spill] sm:$0xff] }
 0x2c8   :  { %3493 = vmatpush3.bf16.msra.mxu0 %v4033_v44  ;;  %3525 = vmatpush3.bf16.msra.mxu1 %v4036_v51  ;;  %v4771_v44 = vld [vmem:[#allocation19_spill] sm:$0xff]  ;;  %v4772_v51 = vld [vmem:[#allocation20_spill] sm:$0xff] }
 0x2c9   :  { %3495 = vmatprep.subr.bf16.mxu0 %v4040_v59  ;;  %3527 = vmatprep.subr.bf16.mxu1 %v4042_v60  ;;  %v4773_v59 = vld [vmem:[#allocation21_spill] sm:$0xff]  ;;  %v4774_v60 = vld [vmem:[#allocation22_spill] sm:$0xff] }
 0x2cc   :  { %3497 = vmatpush3.bf16.msra.mxu0 %v4047_v1  ;;  %3529 = vmatpush3.bf16.msra.mxu1 %v4761_v62  ;;  %v4775_v1 = vld [vmem:[#allocation23_spill] sm:$0xff] }
 0x2cd   :  { %3499 = vmatprep.subr.bf16.mxu0 %v4762_v7  ;;  %3531 = vmatprep.subr.bf16.mxu1 %v4763_v8 }
 0x2d0   :  { %3501 = vmatpush3.bf16.msra.mxu0 %v4764_v14  ;;  %3533 = vmatpush3.bf16.msra.mxu1 %v4765_v19 }
 0x2d1   :  { %3503 = vmatprep.subr.bf16.mxu0 %v4766_v24  ;;  %3535 = vmatprep.subr.bf16.mxu1 %v4767_v25 }
 0x2d4   :  { %3505 = vmatpush3.bf16.msra.mxu0 %v4768_v28  ;;  %3537 = vmatpush3.bf16.msra.mxu1 %v4769_v36 }
 0x2d5   :  { %3507 = vmatprep.subr.bf16.mxu0 %v4770_v43  ;;  %3539 = vmatprep.subr.bf16.mxu1 %v4771_v44 }
 0x2d8   :  { %3509 = vmatpush3.bf16.msra.mxu0 %v4772_v51  ;;  %3541 = vmatpush3.bf16.msra.mxu1 %v4773_v59 }
 0x2d9   :  { %3511 = vmatprep.subr.bf16.mxu0 %v4774_v60  ;;  %3543 = vmatprep.subr.bf16.mxu1 %v4775_v1 }
 0x2dc   :  { %3513 = vmatpush3.bf16.msra.mxu0 %v4776_v34  ;;  %3545 = vmatpush3.bf16.msra.mxu1 %v4777_v18 }
 0x2dd   :  { %3547 = vmatprep.subr.bf16.mxu0 %v4778_v41  ;;  %3579 = vmatprep.subr.bf16.mxu1 %v4779_v2 }
 0x32e   :  { %v2980_v27 = vpop.f32.mrb[36].mxu0  ;;  %v3015_v49 = vpop.f32.mrb[36].mxu1 }
 0x32f   :  { %v2981_v42 = vpop.f32.mrb[37].mxu0  ;;  %v3016_v61 = vpop.f32.mrb[37].mxu1 }
 0x330   :  { %v2982_v16 = vadd.f32 %v2981_v42, %v2980_v27  ;;  %v3017_v35 = vadd.f32 %v3016_v61, %v3015_v49 }
 0x332   :  { %v1377_v33 = vadd.f32 %v2982_v16, %v4567_v31 }
 0x334   :  { %v1447_v40 = vadd.f32 %v3017_v35, %v1377_v33 }
 0x34e   :  { %v3050_v38 = vpop.f32.mrb[38].mxu0  ;;  %v3085_v17 = vpop.f32.mrb[38].mxu1 }
 0x34f   :  { %v3051_v15 = vpop.f32.mrb[39].mxu0  ;;  %v3086_v52 = vpop.f32.mrb[39].mxu1 }
 0x350   :  { %v3052_v55 = vadd.f32 %v3051_v15, %v3050_v38  ;;  %v3087_v13 = vadd.f32 %v3086_v52, %v3085_v17 }
 0x352   :  { %v1517_v57 = vadd.f32 %v3052_v55, %v1447_v40  ;;  %v1665_v3 = vpop.f32.mrb[40].mxu0  ;;  %v1706_v9 = vpop.f32.mrb[40].mxu1 }
 0x353   :  { %v1667_v53 = vpop.f32.mrb[41].mxu0  ;;  %v3304_v37 = vpop.f32.mrb[41].mxu1 }
 0x354   :  { %v1587_v45 = vadd.f32 %v3087_v13, %v1517_v57  ;;  %v1669_v30 = vpop.f32.mrb[42].mxu0  ;;  %v1709_v32 = vpop.f32.mrb[42].mxu1 }
 0x355   :  { %v1670_v39 = vpop.f32.mrb[43].mxu0  ;;  %v3305_v63 = vpop.f32.mrb[43].mxu1 }
 0x356   :  { %1590 = vst [vmem:[%s4659_s8] sm:$0x1] %v1587_v45 }
 0x35a   :  { %v1755_v22 = vpop.f32.mrb[44].mxu0  ;;  %v1796_v62 = vpop.f32.mrb[44].mxu1 }
 0x35b   :  { %v1756_v7 = vadd.f32 %v1755_v22, %v1665_v3  ;;  %v1797_v8 = vadd.f32 %v1796_v62, %v1706_v9  ;;  %v1757_v14 = vpop.f32.mrb[45].mxu0  ;;  %v3310_v19 = vpop.f32.mrb[45].mxu1 }
 0x35c   :  { %v1758_v24 = vadd.f32 %v1757_v14, %v1667_v53  ;;  %v1759_v25 = vpop.f32.mrb[46].mxu0  ;;  %v1799_v28 = vpop.f32.mrb[46].mxu1 }
 0x35d   :  { %v1760_v36 = vpop.f32.mrb[47].mxu0  ;;  %v3311_v43 = vpop.f32.mrb[47].mxu1 }
 0x362   :  { %v1856_v44 = vpop.f32.mrb[48].mxu0  ;;  %v1897_v51 = vpop.f32.mrb[48].mxu1 }
 0x363   :  { %v1903_v59 = vadd.f32 %v1856_v44, %v1756_v7  ;;  %v1905_v60 = vadd.f32 %v1897_v51, %v1797_v8  ;;  %v1858_v1 = vpop.f32.mrb[49].mxu0  ;;  %v3316_v34 = vpop.f32.mrb[49].mxu1 }
 0x364   :  { %v1904_v18 = vadd.f32 %v1858_v1, %v1758_v24  ;;  %v1860_v41 = vpop.f32.mrb[50].mxu0  ;;  %v1900_v2 = vpop.f32.mrb[50].mxu1 }
 0x365   :  { %v1861_v27 = vpop.f32.mrb[51].mxu0  ;;  %v3317_v49 = vpop.f32.mrb[51].mxu1 }
 0x36a   :  { %v1960_v42 = vpop.f32.mrb[52].mxu0  ;;  %v2001_v61 = vpop.f32.mrb[52].mxu1 }
 0x36b   :  { %v2007_v16 = vadd.f32 %v1960_v42, %v1903_v59  ;;  %v2009_v35 = vadd.f32 %v2001_v61, %v1905_v60  ;;  %v1962_v33 = vpop.f32.mrb[53].mxu0  ;;  %v3322_v40 = vpop.f32.mrb[53].mxu1 }
 0x36c   :  { %v2008_v38 = vadd.f32 %v1962_v33, %v1904_v18  ;;  %v1964_v17 = vpop.f32.mrb[54].mxu0  ;;  %v2004_v15 = vpop.f32.mrb[54].mxu1 }
 0x36d   :  { %v1965_v52 = vpop.f32.mrb[55].mxu0  ;;  %v3323_v55 = vpop.f32.mrb[55].mxu1 }
 0x372   :  { %v2064_v13 = vpop.f32.mrb[56].mxu0  ;;  %v2105_v57 = vpop.f32.mrb[56].mxu1 }
 0x373   :  { %v2111_v3 = vadd.f32 %v2064_v13, %v2007_v16  ;;  %v2113_v9 = vadd.f32 %v2105_v57, %v2009_v35  ;;  %v2066_v53 = vpop.f32.mrb[57].mxu0  ;;  %v3328_v37 = vpop.f32.mrb[57].mxu1 }
 0x374   :  { %v2112_v45 = vadd.f32 %v2066_v53, %v2008_v38  ;;  %v2068_v30 = vpop.f32.mrb[58].mxu0  ;;  %v2108_v32 = vpop.f32.mrb[58].mxu1 }
 0x375   :  { %v2069_v39 = vpop.f32.mrb[59].mxu0  ;;  %v3329_v63 = vpop.f32.mrb[59].mxu1 }
 0x376   :  { %v4780_v39 = vld [vmem:[#allocation6_spill] sm:$0xff] }
 0x37a   :  { %v2168_v22 = vpop.f32.mrb[60].mxu0  ;;  %v2209_v62 = vpop.f32.mrb[60].mxu1 }
 0x37b   :  { %v2215_v7 = vadd.f32 %v2168_v22, %v2111_v3  ;;  %v2217_v8 = vadd.f32 %v2209_v62, %v2113_v9  ;;  %v2170_v14 = vpop.f32.mrb[61].mxu0  ;;  %v3334_v19 = vpop.f32.mrb[61].mxu1 }
 0x37c   :  { %v2216_v24 = vadd.f32 %v2170_v14, %v2112_v45  ;;  %v2172_v25 = vpop.f32.mrb[62].mxu0  ;;  %v2212_v28 = vpop.f32.mrb[62].mxu1 }
 0x37d   :  { %v2173_v36 = vpop.f32.mrb[63].mxu0  ;;  %v3335_v43 = vpop.f32.mrb[63].mxu1  ;;  %v4781_v25 = vld [vmem:[#allocation7_spill] sm:$0xff] }
 0x37e   :  { %v4782_v36 = vld [vmem:[#allocation8_spill] sm:$0xff] }
 0x382   :  { %v2272_v44 = vpop.f32.mrb[64].mxu0  ;;  %v2313_v51 = vpop.f32.mrb[64].mxu1 }
 0x383   :  { %v2319_v59 = vadd.f32 %v2272_v44, %v2215_v7  ;;  %v2321_v60 = vadd.f32 %v2313_v51, %v2217_v8  ;;  %v2274_v1 = vpop.f32.mrb[65].mxu0  ;;  %v3340_v34 = vpop.f32.mrb[65].mxu1  ;;  %v4783_v44 = vld [vmem:[#allocation9_spill] sm:$0xff] }
 0x384   :  { %v2320_v18 = vadd.f32 %v2274_v1, %v2216_v24  ;;  %v2276_v41 = vpop.f32.mrb[66].mxu0  ;;  %v2316_v2 = vpop.f32.mrb[66].mxu1  ;;  %v3638_v34 = vld [vmem:[%s4655_s4 + $0x8] sm:$0xff] }
 0x385   :  { %v2277_v27 = vpop.f32.mrb[67].mxu0  ;;  %v3341_v49 = vpop.f32.mrb[67].mxu1  ;;  %v3639_v41 = vld [vmem:[%s4655_s4 + $0x18] sm:$0xff] }
 0x386   :  { %v3640_v27 = vld [vmem:[%s4655_s4] sm:$0xff] }
 0x38a   :  { %v2376_v42 = vpop.f32.mrb[68].mxu0  ;;  %v2417_v61 = vpop.f32.mrb[68].mxu1 }
 0x38b   :  { %v2423_v16 = vadd.f32 %v2376_v42, %v2319_v59  ;;  %v2425_v35 = vadd.f32 %v2417_v61, %v2321_v60  ;;  %v2378_v33 = vpop.f32.mrb[69].mxu0  ;;  %v3346_v40 = vpop.f32.mrb[69].mxu1  ;;  %v3641_v42 = vld [vmem:[%s4655_s4 + $0x10] sm:$0xff] }
 0x38c   :  { %v2424_v38 = vadd.f32 %v2378_v33, %v2320_v18  ;;  %v2380_v17 = vpop.f32.mrb[70].mxu0  ;;  %v2420_v15 = vpop.f32.mrb[70].mxu1  ;;  %v3643_v33 = vld [vmem:[%s4655_s4 + $0x38] sm:$0xff] }
 0x38d   :  { %v2381_v52 = vpop.f32.mrb[71].mxu0  ;;  %v3347_v55 = vpop.f32.mrb[71].mxu1 }
 0x392   :  { %v2480_v13 = vpop.f32.mrb[72].mxu0  ;;  %v2521_v57 = vpop.f32.mrb[72].mxu1 }
 0x393   :  { %v2527_v3 = vadd.f32 %v2480_v13, %v2423_v16  ;;  %v2529_v9 = vadd.f32 %v2521_v57, %v2425_v35  ;;  %v2482_v53 = vpop.f32.mrb[73].mxu0  ;;  %v3352_v37 = vpop.f32.mrb[73].mxu1  ;;  %v3642_v16 = vld [vmem:[%s4655_s4 + $0x28] sm:$0xff] }
 0x394   :  { %v2528_v45 = vadd.f32 %v2482_v53, %v2424_v38  ;;  %v2484_v30 = vpop.f32.mrb[74].mxu0  ;;  %v2524_v32 = vpop.f32.mrb[74].mxu1 }
 0x395   :  { %v2530_v63 = vadd.f32 %v2527_v3, %v4780_v39  ;;  %v2532_v22 = vadd.f32 %v2529_v9, %v4780_v39  ;;  %v2485_v62 = vpop.f32.mrb[75].mxu0  ;;  %v3353_v7 = vpop.f32.mrb[75].mxu1 }
 0x396   :  { %v2531_v8 = vadd.f32 %v2528_v45, %v4780_v39 }
 0x397   :  { %v2533_v14 = vmax.f32 %v2530_v63, 0.0  ;;  %v2535_v19 = vmax.f32 %v2532_v22, 0.0 }
 0x398   :  { %v2534_v24 = vmax.f32 %v2531_v8, 0.0 }
 0x399   :  { %v2536_v28 = vmul.f32 %v2533_v14, %v4781_v25  ;;  %v2538_v51 = vmul.f32 %v2535_v19, %v4783_v44 }
 0x39a   :  { %v2537_v43 = vmul.f32 %v2534_v24, %v4782_v36 }
 0x39c   :  { %v2539_v59 = vadd.f32 %v2537_v43, %v2536_v28 }
 0x39e   :  { %v2540_v60 = vadd.f32 %v2539_v59, %v2538_v51 }
 0x3a0   :  { %2541 = vadd.xlane.f32.xlu0 %v2540_v60 }
 0x42d   :  { %v4579_v1 = vpop.xlane.xlu0 %2541 }
 0x42e   :  { %v2544_v18 = vmul.f32 %v3638_v34, %v4579_v1  ;;  %v2546_v2 = vmul.f32 %v3639_v41, %v4579_v1  ;;  %v2543_v49 = vmul.f32 %v3640_v27, %v4579_v1  ;;  %v2545_v61 = vmul.f32 %v3641_v42, %v4579_v1 }
 0x42f   :  { %v2548_v35 = vmul.f32 %v3642_v16, %v4579_v1  ;;  %v2550_v40 = vmul.f32 %v3643_v33, %v4579_v1 }
 0x430   :  { %v2557_v38 = vrot.slane %v2544_v18, 4  ;;  %v2569_v17 = vrot.slane %v2546_v2, 4  ;;  %v2551_v15 = vrot.slane %v2543_v49, 4  ;;  %v2563_v52 = vrot.slane %v2545_v61, 4 }
 0x431   :  { %v2581_v55 = vrot.slane %v2548_v35, 4  ;;  %v2593_v13 = vrot.slane %v2550_v40, 4 }
 0x432   :  { %v2558_v57 = vadd.f32 %v2557_v38, %v2544_v18  ;;  %v2570_v3 = vadd.f32 %v2569_v17, %v2546_v2  ;;  %v2552_v9 = vadd.f32 %v2551_v15, %v2543_v49  ;;  %v2564_v53 = vadd.f32 %v2563_v52, %v2545_v61  ;;  %v4787_v38 = vld [vmem:[#allocation30_spill] sm:$0xff]  ;;  %v4788_v17 = vld [vmem:[#allocation32_spill] sm:$0xff] }
 0x433   :  { %v2582_v37 = vadd.f32 %v2581_v55, %v2548_v35  ;;  %v2594_v45 = vadd.f32 %v2593_v13, %v2550_v40  ;;  %v4786_v40 = vld [vmem:[#allocation29_spill] sm:$0xff]  ;;  %v4792_v52 = vld [vmem:[#allocation36_spill] sm:$0xff]  ;;  %v4794_v13 = vld [vmem:[#allocation38_spill] sm:$0xff] }
 0x434   :  { %v2559_v30 = vrot.slane %v2558_v57, 2  ;;  %v2571_v32 = vrot.slane %v2570_v3, 2  ;;  %v2553_v39 = vrot.slane %v2552_v9, 2  ;;  %v2565_v63 = vrot.slane %v2564_v53, 2  ;;  %v4793_v55 = vld [vmem:[#allocation37_spill] sm:$0xff] }
 0x435   :  { %v2583_v22 = vrot.slane %v2582_v37, 2  ;;  %v2595_v62 = vrot.slane %v2594_v45, 2 }
 0x436   :  { %v2560_v7 = vadd.f32 %v2559_v30, %v2558_v57  ;;  %v2572_v8 = vadd.f32 %v2571_v32, %v2570_v3  ;;  %v2554_v14 = vadd.f32 %v2553_v39, %v2552_v9  ;;  %v2566_v19 = vadd.f32 %v2565_v63, %v2564_v53  ;;  %v4796_v9 = vld [vmem:[#allocation40_spill] sm:$0xff]  ;;  %v4797_v53 = vld [vmem:[#allocation41_spill] sm:$0xff] }
 0x437   :  { %v2584_v24 = vadd.f32 %v2583_v22, %v2582_v37  ;;  %v2596_v25 = vadd.f32 %v2595_v62, %v2594_v45  ;;  %v4798_v37 = vld [vmem:[#allocation42_spill] sm:$0xff]  ;;  %v4799_v45 = vld [vmem:[#allocation43_spill] sm:$0xff]  ;;  %v4800_v39 = vld [vmem:[#allocation44_spill] sm:$0xff] }
 0x438   :  { %v2561_v28 = vrot.slane %v2560_v7, 1  ;;  %v2573_v36 = vrot.slane %v2572_v8, 1  ;;  %v2555_v43 = vrot.slane %v2554_v14, 1  ;;  %v2567_v44 = vrot.slane %v2566_v19, 1  ;;  %v4801_v63 = vld [vmem:[#allocation45_spill] sm:$0xff]  ;;  %v4802_v22 = vld [vmem:[#allocation46_spill] sm:$0xff] }
 0x439   :  { %v2585_v51 = vrot.slane %v2584_v24, 1  ;;  %v2597_v59 = vrot.slane %v2596_v25, 1 }
 0x43a   :  { %v2562_v60 = vadd.f32 %v2561_v28, %v2560_v7  ;;  %v2574_v34 = vadd.f32 %v2573_v36, %v2572_v8  ;;  %v2556_v18 = vadd.f32 %v2555_v43, %v2554_v14  ;;  %v2568_v41 = vadd.f32 %v2567_v44, %v2566_v19  ;;  %v4803_v8 = vld [vmem:[#allocation47_spill] sm:$0xff]  ;;  %v4804_v14 = vld [vmem:[#allocation48_spill] sm:$0xff] }
 0x43b   :  { %v2586_v2 = vadd.f32 %v2585_v51, %v2584_v24  ;;  %v2598_v27 = vadd.f32 %v2597_v59, %v2596_v25 }
 0x43c   :  { %v2600_v49 = vadd.f32 %v2562_v60, %v4214_v29  ;;  %v2602_v42 = vadd.f32 %v2574_v34, %v4217_v5  ;;  %v2599_v61 = vadd.f32 %v2556_v18, %v4222_v12  ;;  %v2601_v16 = vadd.f32 %v2568_v41, %v4227_v26  ;;  %v4784_v29 = vld [vmem:[#allocation28_spill] sm:$0xff]  ;;  %v4785_v12 = vld [vmem:[#allocation31_spill] sm:$0xff] }
 0x43d   :  { %v2604_v35 = vadd.f32 %v2586_v2, %v4230_v54  ;;  %v2606_v33 = vadd.f32 %v2598_v27, %v4233_v56  ;;  %v2547_v5 = vmul.f32 %v4579_v1, %v4784_v29  ;;  %v2549_v26 = vmul.f32 %v4579_v1, %v4785_v12  ;;  %v4789_v54 = vld [vmem:[#allocation33_spill] sm:$0xff]  ;;  %v4790_v56 = vld [vmem:[#allocation34_spill] sm:$0xff]  ;;  %v4795_v1 = vld [vmem:[#allocation39_spill] sm:$0xff] }
 0x43e   :  { %2671 = vmatprep.mubr.f32.mxu0 %v2600_v49  ;;  %2741 = vmatprep.mubr.f32.mxu1 %v2602_v42 }
 0x43f   :  { %2672 = vmatmul.mubr.f32.vlgmr.msra.gmra.mrb[76].mxu0 %v2599_v61  ;;  %2742 = vmatmul.mubr.f32.vlgmr.msra.gmra.mrb[76].mxu1 %v2601_v16  ;;  %v2587_v15 = vrot.slane %v2549_v26, 4 }
 0x440   :  { %3549 = vmatpush3.bf16.msra.mxu0 %v4237_v47  ;;  %3581 = vmatpush3.bf16.msra.mxu1 %v4239_v6  ;;  %v4791_v47 = vld [vmem:[#allocation35_spill] sm:$0xff]  ;;  %v2575_v6 = vrot.slane %v2547_v5, 4 }
 0x441   :  { %2811 = vmatprep.mubr.f32.mxu0 %v2604_v35  ;;  %2881 = vmatprep.mubr.f32.mxu1 %v2606_v33  ;;  %v2588_v3 = vadd.f32 %v2587_v15, %v2549_v26 }
 0x442   :  { %3551 = vmatprep.subr.bf16.mxu0 %v4786_v40  ;;  %3583 = vmatprep.subr.bf16.mxu1 %v4787_v38  ;;  %v2576_v57 = vadd.f32 %v2575_v6, %v2547_v5 }
 0x443   :  { %v2589_v32 = vrot.slane %v2588_v3, 2 }
 0x444   :  { %3553 = vmatpush3.bf16.msra.mxu0 %v4788_v17  ;;  %3585 = vmatpush3.bf16.msra.mxu1 %v4789_v54  ;;  %v2577_v30 = vrot.slane %v2576_v57, 2 }
 0x445   :  { %3555 = vmatprep.subr.bf16.mxu0 %v4790_v56  ;;  %3587 = vmatprep.subr.bf16.mxu1 %v4791_v47  ;;  %v2590_v7 = vadd.f32 %v2589_v32, %v2588_v3 }
 0x446   :  { %v2578_v62 = vadd.f32 %v2577_v30, %v2576_v57 }
 0x447   :  { %v2591_v24 = vrot.slane %v2590_v7, 1 }
 0x448   :  { %3557 = vmatpush3.bf16.msra.mxu0 %v4792_v52  ;;  %3589 = vmatpush3.bf16.msra.mxu1 %v4793_v55  ;;  %v2579_v19 = vrot.slane %v2578_v62, 1 }
 0x449   :  { %3559 = vmatprep.subr.bf16.mxu0 %v4794_v13  ;;  %3591 = vmatprep.subr.bf16.mxu1 %v4795_v1  ;;  %v2592_v25 = vadd.f32 %v2591_v24, %v2590_v7 }
 0x44c   :  { %3561 = vmatpush3.bf16.msra.mxu0 %v4796_v9  ;;  %3593 = vmatpush3.bf16.msra.mxu1 %v4797_v53 }
 0x44d   :  { %3563 = vmatprep.subr.bf16.mxu0 %v4798_v37  ;;  %3595 = vmatprep.subr.bf16.mxu1 %v4799_v45 }
 0x450   :  { %3565 = vmatpush3.bf16.msra.mxu0 %v4800_v39  ;;  %3597 = vmatpush3.bf16.msra.mxu1 %v4801_v63 }
 0x451   :  { %3567 = vmatprep.subr.bf16.mxu0 %v4315_v4  ;;  %3599 = vmatprep.subr.bf16.mxu1 %v4802_v22  ;;  %v2580_v4 = vadd.f32 %v2579_v19, %v2578_v62 }
 0x454   :  { %3569 = vmatpush3.bf16.msra.mxu0 %v4803_v8  ;;  %3601 = vmatpush3.bf16.msra.mxu1 %v4804_v14 }
 0x455   :  { %3571 = vmatprep.subr.bf16.mxu0 %v4325_v11  ;;  %3603 = vmatprep.subr.bf16.mxu1 %v4329_v20  ;;  %v2603_v11 = vadd.f32 %v2580_v4, %v4348_v23  ;;  %v2605_v20 = vadd.f32 %v2592_v25, %v4366_v46 }
 0x458   :  { %3573 = vmatpush3.bf16.msra.mxu0 %v4336_v48  ;;  %3605 = vmatpush3.bf16.msra.mxu1 %v4338_v21 }
 0x459   :  { %3575 = vmatprep.subr.bf16.mxu0 %v4343_v58  ;;  %3607 = vmatprep.subr.bf16.mxu1 %v4345_v10 }
 0x45c   :  { %3577 = vmatpush3.bf16.msra.mxu0 %v4357_v50  ;;  %3609 = vmatpush3.bf16.msra.mxu1 %v4359_v0 }
 0x45f   :  { %2812 = vmatmul.mubr.f32.vlgmr.msra.gmra.mrb[78].mxu0 %v2603_v11  ;;  %2882 = vmatmul.mubr.f32.vlgmr.msra.gmra.mrb[78].mxu1 %v2605_v20 }
 0x512   :  { %v3138_v28 = vpop.f32.mrb[76].mxu0  ;;  %v3173_v48 = vpop.f32.mrb[76].mxu1 }
 0x513   :  { %v3139_v36 = vpop.f32.mrb[77].mxu0  ;;  %v3174_v21 = vpop.f32.mrb[77].mxu1 }
 0x514   :  { %v3140_v43 = vadd.f32 %v3139_v36, %v3138_v28  ;;  %v3175_v58 = vadd.f32 %v3174_v21, %v3173_v48 }
 0x516   :  { %v2674_v10 = vadd.f32 %v3140_v43, %v4567_v31 }
 0x518   :  { %v2744_v44 = vadd.f32 %v3175_v58, %v2674_v10 }
 0x532   :  { %v3208_v51 = vpop.f32.mrb[78].mxu0  ;;  %v3243_v59 = vpop.f32.mrb[78].mxu1 }
 0x533   :  { %v3209_v50 = vpop.f32.mrb[79].mxu0  ;;  %v3244_v60 = vpop.f32.mrb[79].mxu1 }
 0x534   :  { %v3210_v0 = vadd.f32 %v3209_v50, %v3208_v51  ;;  %v3245_v34 = vadd.f32 %v3244_v60, %v3243_v59 }
 0x536   :  { %v2814_v23 = vadd.f32 %v3210_v0, %v2744_v44 }
 0x538   :  { %v2884_v18 = vadd.f32 %v3245_v34, %v2814_v23 }
 0x53a   :  { %2887 = vst [vmem:[%s4659_s8 + $0x1] sm:$0x1] %v2884_v18 }
 0x53b   :  { %2892 = vsyncpa [#allocation3], 1 }

</bundles_post_ra>
